<compile_context>
chip_gen: v6e
topology: v6e:2x2x1
jax: 0.10.0
libtpu: 0.0.40
codegen_flags: <defaults>
</compile_context>

<pallas_src>
import functools

import jax
import jax.numpy as jnp
from jax.experimental import pallas as pl
from jax.experimental.pallas import tpu as pltpu


# ----------------------------------------------------------------------------
# Single fused Pallas kernel: all GAT layers + readout + classifier softmax.
#
# Argument layout (all full-array VMEM refs, no grid):
#   xn_ref    : (N, Dn0)   bf16   node features
#   xeT_ref   : (N*N, De0) bf16   edge features, flattened DST-MAJOR: row j*N + i == edge i -> j
#   maskT_ref : (N, N)     f32    transposed adjacency: maskT[j, i] = 1 iff edge i -> j exists
#   memb_ref  : (G, N)     bf16   graph membership (dense sum_nodes)
#   per layer l: Wn_aug_l (Dn_l, H*Fn + 2H) bf16, We_pack_l (De_l, H*Fe + H) bf16  [(De_l, H) for last layer]
#   fc_w_ref  : (Din, C) bf16, fc_b_ref : (1, C) f32
#   out_ref   : (G, C) f32   softmax class probabilities
#   acc_ref   : (N, max H*Fn) f32 VMEM scratch — per-head aggregation slab (replaces lane concat)
# ----------------------------------------------------------------------------
def _fused_forward_kernel(meta, n_layers, xn_ref, xeT_ref, maskT_ref, memb_ref, *refs):
    acc_ref = refs[-1]
    out_ref = refs[-2]
    fc_b_ref = refs[-3]
    fc_w_ref = refs[-4]
    param_refs = refs[:-4]

    N = maskT_ref.shape[0]
    maskT = maskT_ref[...] > 0.5                      # (N, N), [dst, src]
    neg = jnp.float32(-1e30)

    xn_bf = xn_ref[...]                               # bf16 (N, Dn)
    xeT_bf = xeT_ref[...]                             # bf16 (N*N, De), dst-major rows

    for li in range(n_layers):
        H, Fn, Fe = meta[li]
        last = li == n_layers - 1
        wn_aug = param_refs[2 * li][...]              # bf16 (Dn, H*Fn + 2H)
        we_pack = param_refs[2 * li + 1][...]         # bf16 (De, H*Fe + H), last layer: (De, H)

        # one wide node matmul for all heads + folded a_src / a_dst columns (bf16 MXU, f32 acc)
        zn_all = jnp.dot(xn_bf, wn_aug, preferred_element_type=jnp.float32)   # (N, H*Fn + 2H)
        # one wide edge matmul for all heads + folded a_e columns (last layer: a_e columns only)
        ze = jnp.dot(xeT_bf, we_pack, preferred_element_type=jnp.float32)     # (N*N, H*Fe + H) or (N*N, H)

        s_src = zn_all[:, H * Fn: H * Fn + H]          # (N, H)  s_src[i, h]
        s_dst = zn_all[:, H * Fn + H: H * Fn + 2 * H]  # (N, H)  s_dst[j, h]
        s_srcT = s_src.T                               # (H, N)

        # split leading dim only (last dim preserved) -> (dst, src, cols); free reshape
        ze3 = ze.reshape(N, N, ze.shape[1])
        att_off = 0 if last else H * Fe                # folded a_e columns live after the feature columns

        for h in range(H):
            zn_h_bf = zn_all[:, h * Fn:(h + 1) * Fn].astype(jnp.bfloat16)       # (N, Fn)
            # per-head edge attention score = one folded column (width-1 lane reduce), [dst, src]
            s_eT = jnp.sum(ze3[:, :, att_off + h: att_off + h + 1], axis=-1)    # (N, N)

            # transposed logits: [dst on sublanes, src on lanes]
            logitsT = s_dst[:, h:h + 1] + s_srcT[h:h + 1, :] + s_eT
            act = jnp.where(logitsT >= 0, logitsT, jnp.float32(0.2) * logitsT)  # LeakyReLU(0.2)
            scores = jnp.where(maskT, act, neg)

            # masked softmax over incoming edges (source axis = lanes); post-exp mask kept so that
            # nodes with no incoming edges produce zeros (matches the reference semantics exactly).
            smax = jnp.max(scores, axis=-1, keepdims=True)
            p = jnp.where(maskT, jnp.exp(scores - smax), jnp.float32(0.0))
            denom = jnp.maximum(jnp.sum(p, axis=-1, keepdims=True), jnp.float32(1e-9))
            alphaT_bf = (p * pl.reciprocal(denom, approx=True)).astype(jnp.bfloat16)

            # aggregation as a native MXU matmul, written straight into the (N, H*Fn) scratch slab
            acc_ref[:, h * Fn:(h + 1) * Fn] = jnp.dot(
                alphaT_bf, zn_h_bf, preferred_element_type=jnp.float32)

        if not last:
            # F.leaky_relu default slope 0.01 between layers (f32 VPU math)
            xn_f32 = acc_ref[:, : H * Fn]
            xn_bf = jnp.where(xn_f32 >= 0, xn_f32, jnp.float32(0.01) * xn_f32).astype(jnp.bfloat16)
            ze_feat = ze[:, : H * Fe]                  # edge head concat (dst-major), feature columns only
            xeT_bf = jnp.where(ze_feat >= 0, ze_feat, jnp.float32(0.01) * ze_feat).astype(jnp.bfloat16)

    # readout: dgl.sum_nodes -> fc -> softmax
    H_l, Fn_l, _ = meta[-1]
    xn_final_bf = acc_ref[:, : H_l * Fn_l].astype(jnp.bfloat16)
    s = jnp.dot(memb_ref[...], xn_final_bf, preferred_element_type=jnp.float32)          # (G, Din)
    logits = jnp.dot(s.astype(jnp.bfloat16), fc_w_ref[...],
                     preferred_element_type=jnp.float32) + fc_b_ref[...]
    z = logits - jnp.max(logits, axis=-1, keepdims=True)
    pz = jnp.exp(z)
    out_ref[...] = pz / jnp.sum(pz, axis=-1, keepdims=True)


# ----------------------------------------------------------------------------
# Host-side parameter packing: batch heads into wide matmuls and fold the
# rank-1 attention vectors a_src / a_dst / a_e into the projections (bf16).
# Last layer: edge-feature columns are dropped (edge output is discarded).
# ----------------------------------------------------------------------------
def _pack_gat_params(gat_params):
    meta, flat = [], []
    n_layers = len(gat_params)
    for li, p in enumerate(gat_params):
        Wn, We, a_src, a_dst, a_e = p["Wn"], p["We"], p["a_src"], p["a_dst"], p["a_e"]
        H, Dn, Fn = Wn.shape
        _, De, Fe = We.shape
        Wn_all = jnp.transpose(Wn, (1, 0, 2)).reshape(Dn, H * Fn)                 # head-major columns
        Wn_src = jnp.concatenate([Wn[h] @ a_src[h] for h in range(H)], axis=1)    # (Dn, H)
        Wn_dst = jnp.concatenate([Wn[h] @ a_dst[h] for h in range(H)], axis=1)    # (Dn, H)
        Wn_aug = jnp.concatenate([Wn_all, Wn_src, Wn_dst], axis=1).astype(jnp.bfloat16)
        We_att = jnp.concatenate([We[h] @ a_e[h] for h in range(H)], axis=1)      # (De, H) folded a_e
        if li == n_layers - 1:
            We_pack = We_att.astype(jnp.bfloat16)                                 # attention columns only
        else:
            We_all = jnp.transpose(We, (1, 0, 2)).reshape(De, H * Fe)
            We_pack = jnp.concatenate([We_all, We_att], axis=1).astype(jnp.bfloat16)
        flat += [Wn_aug, We_pack]
        meta.append((H, Fn, Fe))
    return tuple(meta), flat


def model_forward(xn, xeT_flat, maskT, memb, gat_params, fc_W, fc_b):
    """Full fused forward. Inputs are DST-MAJOR preprocessed (done once upstream):
         xeT_flat : (N*N, De)  row j*N + i == features of edge i -> j
         maskT    : (N, N)     maskT[j, i] = 1 iff edge i -> j exists
       Returns softmax class probabilities (G, C)."""
    N = xn.shape[0]
    G = memb.shape[0]
    C = fc_W.shape[1]

    meta, flat_params = _pack_gat_params(gat_params)
    n_layers = len(meta)
    max_hfn = max(H * Fn for (H, Fn, _) in meta)

    # bf16 MXU operands (weights already bf16 from packing); mask / bias stay f32
    inputs = [xn.astype(jnp.bfloat16), xeT_flat.astype(jnp.bfloat16),
              maskT.astype(jnp.float32), memb.astype(jnp.bfloat16)] \
             + flat_params + [fc_W.astype(jnp.bfloat16), fc_b.reshape(1, C).astype(jnp.float32)]

    # scoped-VMEM limit sized from the working set (defaults: 16 MiB v5e / 32 MiB v6e,v7x)
    in_bytes = sum(int(a.size) * a.dtype.itemsize for a in inputs)
    max_ew = max(H * Fe + H for (H, _, Fe) in meta)
    inter_bytes = 4 * N * N * (max_ew + 6) + 4 * N * (4 * max_hfn + 64)
    vmem_limit = int(min(max(3 * (in_bytes + inter_bytes), 32 * 1024 * 1024), 100 * 1024 * 1024))

    kernel = functools.partial(_fused_forward_kernel, meta, n_layers)
    vmem = pl.BlockSpec(memory_space=pltpu.MemorySpace.VMEM)

    return pl.pallas_call(
        kernel,
        out_shape=jax.ShapeDtypeStruct((G, C), jnp.float32),
        in_specs=[vmem] * len(inputs),
        out_specs=vmem,
        scratch_shapes=[pltpu.VMEM((N, max_hfn), jnp.float32)],
        compiler_params=pltpu.CompilerParams(vmem_limit_bytes=vmem_limit),
    )(*inputs)


# ----------------------------------------------------------------------------
# Pure-JAX f32 reference (same math) for a correctness check.
# ----------------------------------------------------------------------------
def _ref_gat_layer(xn, xe, mask, p):
    H = p["Wn"].shape[0]
    N = xn.shape[0]
    outs_n, outs_e = [], []
    m = mask > 0.5
    for h in range(H):
        zn = xn @ p["Wn"][h]
        ze = xe.reshape(N * N, -1) @ p["We"][h]
        s_src = zn @ p["a_src"][h]
        s_dst = zn @ p["a_dst"][h]
        s_e = (ze @ p["a_e"][h]).reshape(N, N)
        logits = s_src + s_dst.reshape(1, N) + s_e
        act = jnp.where(logits >= 0, logits, 0.2 * logits)
        scores = jnp.where(m, act, -1e30)
        smax = jnp.max(scores, axis=0, keepdims=True)
        pr = jnp.where(m, jnp.exp(scores - smax), 0.0)
        alpha = pr / jnp.maximum(jnp.sum(pr, axis=0, keepdims=True), 1e-9)
        outs_n.append(alpha.T @ zn)
        outs_e.append(ze.reshape(N, N, -1))
    return jnp.concatenate(outs_n, axis=1), jnp.concatenate(outs_e, axis=2)


def _ref_forward(xn, xe, mask, memb, gat_params, fc_W, fc_b):
    for li, p in enumerate(gat_params):
        xn, xe = _ref_gat_layer(xn, xe, mask, p)
        if li < len(gat_params) - 1:
            xn = jnp.where(xn >= 0, xn, 0.01 * xn)
            xe = jnp.where(xe >= 0, xe, 0.01 * xe)
    s = memb @ xn
    logits = s @ fc_W + fc_b
    return jax.nn.softmax(logits, axis=1)


# ----------------------------------------------------------------------------
# Deterministic parameter / input construction.
# ----------------------------------------------------------------------------
def init_params(key, node_dim, edge_dim, n_heads, hidden_dim, e_hidden_dim, n_classes):
    gat_params = []
    nd, ed = node_dim, edge_dim
    for i in range(len(n_heads)):
        H, Fn, Fe = n_heads[i], hidden_dim[i], e_hidden_dim[i]
        key, k1, k2, k3, k4, k5 = jax.random.split(key, 6)
        gat_params.append(dict(
            Wn=jax.random.normal(k1, (H, nd, Fn), jnp.float32) * 0.3,
            We=jax.random.normal(k2, (H, ed, Fe), jnp.float32) * 0.3,
            a_src=jax.random.normal(k3, (H, Fn, 1), jnp.float32) * 0.3,
            a_dst=jax.random.normal(k4, (H, Fn, 1), jnp.float32) * 0.3,
            a_e=jax.random.normal(k5, (H, Fe, 1), jnp.float32) * 0.3,
        ))
        nd, ed = H * Fn, H * Fe
    key, k1, k2 = jax.random.split(key, 3)
    fc_W = jax.random.normal(k1, (nd, n_classes), jnp.float32) * 0.1
    fc_b = jax.random.normal(k2, (n_classes,), jnp.float32) * 0.1
    return gat_params, fc_W, fc_b


if __name__ == "__main__":
    key = jax.random.PRNGKey(0)

    # small graph batch: G=2 graphs x 8 nodes = 16 nodes total
    G, nodes_per_graph = 2, 8
    N = G * nodes_per_graph
    types_dim, labels_dim = 2, 4          # node_dim = 6 (node_features_use='all')
    edge_label_dim = 3                    # edge_dim = 3 (edge_features_use='label')

    n_heads = [2, 2]
    hidden_dim = [8, 8]
    e_hidden_dim = [4, 4]
    n_classes = 3

    key, kt, kl, ke, ka = jax.random.split(key, 5)
    node_types = jax.random.normal(kt, (N, types_dim), jnp.float32)
    node_labels = jax.random.normal(kl, (N, labels_dim), jnp.float32)
    xn = jnp.concatenate([node_types, node_labels], axis=1)           # [N, 6]

    # block-diagonal adjacency (no cross-graph edges) + self loops
    rand_adj = (jax.random.uniform(ka, (N, N)) < 0.4).astype(jnp.float32)
    block = jnp.kron(jnp.eye(G, dtype=jnp.float32),
                     jnp.ones((nodes_per_graph, nodes_per_graph), jnp.float32))
    mask = jnp.clip(rand_adj * block + jnp.eye(N, dtype=jnp.float32), 0.0, 1.0)

    edge_feats = jax.random.normal(ke, (N, N, edge_label_dim), jnp.float32) * mask[..., None]

    memb = jnp.kron(jnp.eye(G, dtype=jnp.float32),
                    jnp.ones((1, nodes_per_graph), jnp.float32))      # [G, N]

    gat_params, fc_W, fc_b = init_params(
        jax.random.PRNGKey(42), xn.shape[1], edge_label_dim,
        n_heads, hidden_dim, e_hidden_dim, n_classes)

    # --- one-time graph preprocessing (outside the per-call path): dst-major edges + transposed mask ---
    xeT_flat = jnp.transpose(edge_feats, (1, 0, 2)).reshape(N * N, edge_label_dim)
    maskT = jnp.transpose(mask)

    out = model_forward(xn, xeT_flat, maskT, memb, gat_params, fc_W, fc_b)
    out = jax.block_until_ready(out)

    ref = jax.block_until_ready(
        _ref_forward(xn, edge_feats, mask, memb, gat_params, fc_W, fc_b))

    assert out.shape == (G, n_classes), out.shape
    assert jnp.allclose(jnp.sum(out, axis=1), 1.0, atol=1e-4)
    # bf16 MXU operands -> slightly looser tolerance vs the f32 reference
    assert jnp.allclose(out, ref, atol=5e-2, rtol=5e-2), (out, ref)

    print("KERNEL_OK")
</pallas_src>

<mosaic_0001>
module attributes {stable_mosaic.version = 11 : i64} {
  func.func @_fused_forward_kernel(%arg0: memref<16x6xbf16, #tpu.memory_space<vmem>>, %arg1: memref<256x3xbf16, #tpu.memory_space<vmem>>, %arg2: memref<16x16xf32, #tpu.memory_space<vmem>>, %arg3: memref<2x16xbf16, #tpu.memory_space<vmem>>, %arg4: memref<6x20xbf16, #tpu.memory_space<vmem>>, %arg5: memref<3x10xbf16, #tpu.memory_space<vmem>>, %arg6: memref<16x20xbf16, #tpu.memory_space<vmem>>, %arg7: memref<8x2xbf16, #tpu.memory_space<vmem>>, %arg8: memref<16x3xbf16, #tpu.memory_space<vmem>>, %arg9: memref<1x3xf32, #tpu.memory_space<vmem>>, %arg10: memref<2x3xf32, #tpu.memory_space<vmem>>, %arg11: memref<16x16xf32, #tpu.memory_space<vmem>>) attributes {dimension_semantics = [], scalar_prefetch = 0 : i64, scratch_operands = 1 : i64, tpu.core_type = #tpu.core_type<tc>} {
    %c0 = arith.constant 0 : index
    %c0_0 = arith.constant 0 : index
    %0 = vector.load %arg2[%c0, %c0_0] : memref<16x16xf32, #tpu.memory_space<vmem>>, vector<16x16xf32>
    %cst = arith.constant 5.000000e-01 : f32
    %1 = vector.broadcast %cst : f32 to vector<16x16xf32>
    %2 = arith.cmpf ogt, %0, %1 : vector<16x16xf32>
    %c0_1 = arith.constant 0 : index
    %c0_2 = arith.constant 0 : index
    %3 = vector.load %arg0[%c0_1, %c0_2] : memref<16x6xbf16, #tpu.memory_space<vmem>>, vector<16x6xbf16>
    %c0_3 = arith.constant 0 : index
    %c0_4 = arith.constant 0 : index
    %4 = vector.load %arg1[%c0_3, %c0_4] : memref<256x3xbf16, #tpu.memory_space<vmem>>, vector<256x3xbf16>
    %c0_5 = arith.constant 0 : index
    %c0_6 = arith.constant 0 : index
    %5 = vector.load %arg4[%c0_5, %c0_6] : memref<6x20xbf16, #tpu.memory_space<vmem>>, vector<6x20xbf16>
    %c0_7 = arith.constant 0 : index
    %c0_8 = arith.constant 0 : index
    %6 = vector.load %arg5[%c0_7, %c0_8] : memref<3x10xbf16, #tpu.memory_space<vmem>>, vector<3x10xbf16>
    %cst_9 = arith.constant dense<0.000000e+00> : vector<16x20xf32>
    %7 = tpu.matmul %3, %5, %cst_9 {dimension_numbers = #tpu.dot_dimension_numbers<[1], [0], [0], [1], [0, 0, 1, 1], [], []>} : vector<16x6xbf16>, vector<6x20xbf16>, vector<16x20xf32> -> vector<16x20xf32>
    %cst_10 = arith.constant dense<0.000000e+00> : vector<256x10xf32>
    %8 = tpu.matmul %4, %6, %cst_10 {dimension_numbers = #tpu.dot_dimension_numbers<[1], [0], [0], [1], [0, 0, 1, 1], [], []>} : vector<256x3xbf16>, vector<3x10xbf16>, vector<256x10xf32> -> vector<256x10xf32>
    %9 = vector.extract_strided_slice %7 {offsets = [0, 16], sizes = [16, 2], strides = [1, 1]} : vector<16x20xf32> to vector<16x2xf32>
    %10 = vector.extract_strided_slice %7 {offsets = [0, 18], sizes = [16, 2], strides = [1, 1]} : vector<16x20xf32> to vector<16x2xf32>
    %11 = tpu.transpose %9, [1, 0] : vector<16x2xf32> -> vector<2x16xf32>
    %12 = vector.shape_cast %8 : vector<256x10xf32> to vector<16x16x10xf32>
    %13 = vector.extract_strided_slice %7 {offsets = [0, 0], sizes = [16, 8], strides = [1, 1]} : vector<16x20xf32> to vector<16x8xf32>
    %14 = arith.truncf %13 : vector<16x8xf32> to vector<16x8xbf16>
    %15 = vector.extract_strided_slice %12 {offsets = [0, 0, 8], sizes = [16, 16, 1], strides = [1, 1, 1]} : vector<16x16x10xf32> to vector<16x16x1xf32>
    %cst_11 = arith.constant dense<0.000000e+00> : vector<16x16xf32>
    %16 = vector.multi_reduction <add>, %15, %cst_11 [2] : vector<16x16x1xf32> to vector<16x16xf32>
    %17 = vector.extract_strided_slice %10 {offsets = [0, 0], sizes = [16, 1], strides = [1, 1]} : vector<16x2xf32> to vector<16x1xf32>
    %18 = vector.extract_strided_slice %11 {offsets = [0, 0], sizes = [1, 16], strides = [1, 1]} : vector<2x16xf32> to vector<1x16xf32>
    %19 = vector.broadcast %17 : vector<16x1xf32> to vector<16x16xf32>
    %20 = vector.broadcast %18 : vector<1x16xf32> to vector<16x16xf32>
    %21 = arith.addf %19, %20 : vector<16x16xf32>
    %22 = arith.addf %21, %16 : vector<16x16xf32>
    %cst_12 = arith.constant 0.000000e+00 : f32
    %23 = vector.broadcast %cst_12 : f32 to vector<16x16xf32>
    %24 = arith.cmpf oge, %22, %23 : vector<16x16xf32>
    %cst_13 = arith.constant 2.000000e-01 : f32
    %25 = vector.broadcast %cst_13 : f32 to vector<16x16xf32>
    %26 = arith.mulf %25, %22 : vector<16x16xf32>
    %27 = arith.select %24, %22, %26 : vector<16x16xi1>, vector<16x16xf32>
    %cst_14 = arith.constant -1.000000e+30 : f32
    %28 = vector.broadcast %cst_14 : f32 to vector<16x16xf32>
    %29 = arith.select %2, %27, %28 : vector<16x16xi1>, vector<16x16xf32>
    %cst_15 = arith.constant dense<0xFF800000> : vector<16xf32>
    %30 = vector.multi_reduction <maximumf>, %29, %cst_15 [1] : vector<16x16xf32> to vector<16xf32>
    %31 = vector.shape_cast %30 : vector<16xf32> to vector<16x1xf32>
    %32 = vector.broadcast %31 : vector<16x1xf32> to vector<16x16xf32>
    %33 = arith.subf %29, %32 : vector<16x16xf32>
    %34 = math.exp %33 : vector<16x16xf32>
    %cst_16 = arith.constant 0.000000e+00 : f32
    %35 = vector.broadcast %cst_16 : f32 to vector<16x16xf32>
    %36 = arith.select %2, %34, %35 : vector<16x16xi1>, vector<16x16xf32>
    %cst_17 = arith.constant dense<0.000000e+00> : vector<16xf32>
    %37 = vector.multi_reduction <add>, %36, %cst_17 [1] : vector<16x16xf32> to vector<16xf32>
    %38 = vector.shape_cast %37 : vector<16xf32> to vector<16x1xf32>
    %cst_18 = arith.constant 9.99999971E-10 : f32
    %39 = vector.broadcast %cst_18 : f32 to vector<16x1xf32>
    %40 = arith.maximumf %38, %39 : vector<16x1xf32>
    %41 = tpu.reciprocal %40 {approx = true} : vector<16x1xf32> -> vector<16x1xf32>
    %42 = vector.broadcast %41 : vector<16x1xf32> to vector<16x16xf32>
    %43 = arith.mulf %36, %42 : vector<16x16xf32>
    %44 = arith.truncf %43 : vector<16x16xf32> to vector<16x16xbf16>
    %cst_19 = arith.constant dense<0.000000e+00> : vector<16x8xf32>
    %45 = tpu.matmul %44, %14, %cst_19 {dimension_numbers = #tpu.dot_dimension_numbers<[1], [0], [0], [1], [0, 0, 1, 1], [], []>} : vector<16x16xbf16>, vector<16x8xbf16>, vector<16x8xf32> -> vector<16x8xf32>
    %c0_20 = arith.constant 0 : index
    %c0_21 = arith.constant 0 : index
    %46 = vector.load %arg11[%c0_20, %c0_21] : memref<16x16xf32, #tpu.memory_space<vmem>>, vector<16x8xf32>
    tpu.vector_store %arg11[%c0_20, %c0_21], %45 {strides = array<i32>} : memref<16x16xf32, #tpu.memory_space<vmem>>, vector<16x8xf32>,
    %47 = vector.extract_strided_slice %7 {offsets = [0, 8], sizes = [16, 8], strides = [1, 1]} : vector<16x20xf32> to vector<16x8xf32>
    %48 = arith.truncf %47 : vector<16x8xf32> to vector<16x8xbf16>
    %49 = vector.extract_strided_slice %12 {offsets = [0, 0, 9], sizes = [16, 16, 1], strides = [1, 1, 1]} : vector<16x16x10xf32> to vector<16x16x1xf32>
    %cst_22 = arith.constant dense<0.000000e+00> : vector<16x16xf32>
    %50 = vector.multi_reduction <add>, %49, %cst_22 [2] : vector<16x16x1xf32> to vector<16x16xf32>
    %51 = vector.extract_strided_slice %10 {offsets = [0, 1], sizes = [16, 1], strides = [1, 1]} : vector<16x2xf32> to vector<16x1xf32>
    %52 = vector.extract_strided_slice %11 {offsets = [1, 0], sizes = [1, 16], strides = [1, 1]} : vector<2x16xf32> to vector<1x16xf32>
    %53 = vector.broadcast %51 : vector<16x1xf32> to vector<16x16xf32>
    %54 = vector.broadcast %52 : vector<1x16xf32> to vector<16x16xf32>
    %55 = arith.addf %53, %54 : vector<16x16xf32>
    %56 = arith.addf %55, %50 : vector<16x16xf32>
    %cst_23 = arith.constant 0.000000e+00 : f32
    %57 = vector.broadcast %cst_23 : f32 to vector<16x16xf32>
    %58 = arith.cmpf oge, %56, %57 : vector<16x16xf32>
    %cst_24 = arith.constant 2.000000e-01 : f32
    %59 = vector.broadcast %cst_24 : f32 to vector<16x16xf32>
    %60 = arith.mulf %59, %56 : vector<16x16xf32>
    %61 = arith.select %58, %56, %60 : vector<16x16xi1>, vector<16x16xf32>
    %cst_25 = arith.constant -1.000000e+30 : f32
    %62 = vector.broadcast %cst_25 : f32 to vector<16x16xf32>
    %63 = arith.select %2, %61, %62 : vector<16x16xi1>, vector<16x16xf32>
    %cst_26 = arith.constant dense<0xFF800000> : vector<16xf32>
    %64 = vector.multi_reduction <maximumf>, %63, %cst_26 [1] : vector<16x16xf32> to vector<16xf32>
    %65 = vector.shape_cast %64 : vector<16xf32> to vector<16x1xf32>
    %66 = vector.broadcast %65 : vector<16x1xf32> to vector<16x16xf32>
    %67 = arith.subf %63, %66 : vector<16x16xf32>
    %68 = math.exp %67 : vector<16x16xf32>
    %cst_27 = arith.constant 0.000000e+00 : f32
    %69 = vector.broadcast %cst_27 : f32 to vector<16x16xf32>
    %70 = arith.select %2, %68, %69 : vector<16x16xi1>, vector<16x16xf32>
    %cst_28 = arith.constant dense<0.000000e+00> : vector<16xf32>
    %71 = vector.multi_reduction <add>, %70, %cst_28 [1] : vector<16x16xf32> to vector<16xf32>
    %72 = vector.shape_cast %71 : vector<16xf32> to vector<16x1xf32>
    %cst_29 = arith.constant 9.99999971E-10 : f32
    %73 = vector.broadcast %cst_29 : f32 to vector<16x1xf32>
    %74 = arith.maximumf %72, %73 : vector<16x1xf32>
    %75 = tpu.reciprocal %74 {approx = true} : vector<16x1xf32> -> vector<16x1xf32>
    %76 = vector.broadcast %75 : vector<16x1xf32> to vector<16x16xf32>
    %77 = arith.mulf %70, %76 : vector<16x16xf32>
    %78 = arith.truncf %77 : vector<16x16xf32> to vector<16x16xbf16>
    %cst_30 = arith.constant dense<0.000000e+00> : vector<16x8xf32>
    %79 = tpu.matmul %78, %48, %cst_30 {dimension_numbers = #tpu.dot_dimension_numbers<[1], [0], [0], [1], [0, 0, 1, 1], [], []>} : vector<16x16xbf16>, vector<16x8xbf16>, vector<16x8xf32> -> vector<16x8xf32>
    %c0_31 = arith.constant 0 : index
    %c8 = arith.constant 8 : index
    %80 = vector.load %arg11[%c0_31, %c8] : memref<16x16xf32, #tpu.memory_space<vmem>>, vector<16x8xf32>
    tpu.vector_store %arg11[%c0_31, %c8], %79 {strides = array<i32>} : memref<16x16xf32, #tpu.memory_space<vmem>>, vector<16x8xf32>,
    %c0_32 = arith.constant 0 : index
    %c0_33 = arith.constant 0 : index
    %81 = vector.load %arg11[%c0_32, %c0_33] : memref<16x16xf32, #tpu.memory_space<vmem>>, vector<16x16xf32>
    %cst_34 = arith.constant 0.000000e+00 : f32
    %82 = vector.broadcast %cst_34 : f32 to vector<16x16xf32>
    %83 = arith.cmpf oge, %81, %82 : vector<16x16xf32>
    %cst_35 = arith.constant 0.00999999977 : f32
    %84 = vector.broadcast %cst_35 : f32 to vector<16x16xf32>
    %85 = arith.mulf %84, %81 : vector<16x16xf32>
    %86 = arith.select %83, %81, %85 : vector<16x16xi1>, vector<16x16xf32>
    %87 = arith.truncf %86 : vector<16x16xf32> to vector<16x16xbf16>
    %88 = vector.extract_strided_slice %8 {offsets = [0, 0], sizes = [256, 8], strides = [1, 1]} : vector<256x10xf32> to vector<256x8xf32>
    %cst_36 = arith.constant 0.000000e+00 : f32
    %89 = vector.broadcast %cst_36 : f32 to vector<256x8xf32>
    %90 = arith.cmpf oge, %88, %89 : vector<256x8xf32>
    %cst_37 = arith.constant 0.00999999977 : f32
    %91 = vector.broadcast %cst_37 : f32 to vector<256x8xf32>
    %92 = arith.mulf %91, %88 : vector<256x8xf32>
    %93 = arith.select %90, %88, %92 : vector<256x8xi1>, vector<256x8xf32>
    %94 = arith.truncf %93 : vector<256x8xf32> to vector<256x8xbf16>
    %c0_38 = arith.constant 0 : index
    %c0_39 = arith.constant 0 : index
    %95 = vector.load %arg6[%c0_38, %c0_39] : memref<16x20xbf16, #tpu.memory_space<vmem>>, vector<16x20xbf16>
    %c0_40 = arith.constant 0 : index
    %c0_41 = arith.constant 0 : index
    %96 = vector.load %arg7[%c0_40, %c0_41] : memref<8x2xbf16, #tpu.memory_space<vmem>>, vector<8x2xbf16>
    %cst_42 = arith.constant dense<0.000000e+00> : vector<16x20xf32>
    %97 = tpu.matmul %87, %95, %cst_42 {dimension_numbers = #tpu.dot_dimension_numbers<[1], [0], [0], [1], [0, 0, 1, 1], [], []>} : vector<16x16xbf16>, vector<16x20xbf16>, vector<16x20xf32> -> vector<16x20xf32>
    %cst_43 = arith.constant dense<0.000000e+00> : vector<256x2xf32>
    %98 = tpu.matmul %94, %96, %cst_43 {dimension_numbers = #tpu.dot_dimension_numbers<[1], [0], [0], [1], [0, 0, 1, 1], [], []>} : vector<256x8xbf16>, vector<8x2xbf16>, vector<256x2xf32> -> vector<256x2xf32>
    %99 = vector.extract_strided_slice %97 {offsets = [0, 16], sizes = [16, 2], strides = [1, 1]} : vector<16x20xf32> to vector<16x2xf32>
    %100 = vector.extract_strided_slice %97 {offsets = [0, 18], sizes = [16, 2], strides = [1, 1]} : vector<16x20xf32> to vector<16x2xf32>
    %101 = tpu.transpose %99, [1, 0] : vector<16x2xf32> -> vector<2x16xf32>
    %102 = vector.shape_cast %98 : vector<256x2xf32> to vector<16x16x2xf32>
    %103 = vector.extract_strided_slice %97 {offsets = [0, 0], sizes = [16, 8], strides = [1, 1]} : vector<16x20xf32> to vector<16x8xf32>
    %104 = arith.truncf %103 : vector<16x8xf32> to vector<16x8xbf16>
    %105 = vector.extract_strided_slice %102 {offsets = [0, 0, 0], sizes = [16, 16, 1], strides = [1, 1, 1]} : vector<16x16x2xf32> to vector<16x16x1xf32>
    %cst_44 = arith.constant dense<0.000000e+00> : vector<16x16xf32>
    %106 = vector.multi_reduction <add>, %105, %cst_44 [2] : vector<16x16x1xf32> to vector<16x16xf32>
    %107 = vector.extract_strided_slice %100 {offsets = [0, 0], sizes = [16, 1], strides = [1, 1]} : vector<16x2xf32> to vector<16x1xf32>
    %108 = vector.extract_strided_slice %101 {offsets = [0, 0], sizes = [1, 16], strides = [1, 1]} : vector<2x16xf32> to vector<1x16xf32>
    %109 = vector.broadcast %107 : vector<16x1xf32> to vector<16x16xf32>
    %110 = vector.broadcast %108 : vector<1x16xf32> to vector<16x16xf32>
    %111 = arith.addf %109, %110 : vector<16x16xf32>
    %112 = arith.addf %111, %106 : vector<16x16xf32>
    %cst_45 = arith.constant 0.000000e+00 : f32
    %113 = vector.broadcast %cst_45 : f32 to vector<16x16xf32>
    %114 = arith.cmpf oge, %112, %113 : vector<16x16xf32>
    %cst_46 = arith.constant 2.000000e-01 : f32
    %115 = vector.broadcast %cst_46 : f32 to vector<16x16xf32>
    %116 = arith.mulf %115, %112 : vector<16x16xf32>
    %117 = arith.select %114, %112, %116 : vector<16x16xi1>, vector<16x16xf32>
    %cst_47 = arith.constant -1.000000e+30 : f32
    %118 = vector.broadcast %cst_47 : f32 to vector<16x16xf32>
    %119 = arith.select %2, %117, %118 : vector<16x16xi1>, vector<16x16xf32>
    %cst_48 = arith.constant dense<0xFF800000> : vector<16xf32>
    %120 = vector.multi_reduction <maximumf>, %119, %cst_48 [1] : vector<16x16xf32> to vector<16xf32>
    %121 = vector.shape_cast %120 : vector<16xf32> to vector<16x1xf32>
    %122 = vector.broadcast %121 : vector<16x1xf32> to vector<16x16xf32>
    %123 = arith.subf %119, %122 : vector<16x16xf32>
    %124 = math.exp %123 : vector<16x16xf32>
    %cst_49 = arith.constant 0.000000e+00 : f32
    %125 = vector.broadcast %cst_49 : f32 to vector<16x16xf32>
    %126 = arith.select %2, %124, %125 : vector<16x16xi1>, vector<16x16xf32>
    %cst_50 = arith.constant dense<0.000000e+00> : vector<16xf32>
    %127 = vector.multi_reduction <add>, %126, %cst_50 [1] : vector<16x16xf32> to vector<16xf32>
    %128 = vector.shape_cast %127 : vector<16xf32> to vector<16x1xf32>
    %cst_51 = arith.constant 9.99999971E-10 : f32
    %129 = vector.broadcast %cst_51 : f32 to vector<16x1xf32>
    %130 = arith.maximumf %128, %129 : vector<16x1xf32>
    %131 = tpu.reciprocal %130 {approx = true} : vector<16x1xf32> -> vector<16x1xf32>
    %132 = vector.broadcast %131 : vector<16x1xf32> to vector<16x16xf32>
    %133 = arith.mulf %126, %132 : vector<16x16xf32>
    %134 = arith.truncf %133 : vector<16x16xf32> to vector<16x16xbf16>
    %cst_52 = arith.constant dense<0.000000e+00> : vector<16x8xf32>
    %135 = tpu.matmul %134, %104, %cst_52 {dimension_numbers = #tpu.dot_dimension_numbers<[1], [0], [0], [1], [0, 0, 1, 1], [], []>} : vector<16x16xbf16>, vector<16x8xbf16>, vector<16x8xf32> -> vector<16x8xf32>
    %c0_53 = arith.constant 0 : index
    %c0_54 = arith.constant 0 : index
    %136 = vector.load %arg11[%c0_53, %c0_54] : memref<16x16xf32, #tpu.memory_space<vmem>>, vector<16x8xf32>
    tpu.vector_store %arg11[%c0_53, %c0_54], %135 {strides = array<i32>} : memref<16x16xf32, #tpu.memory_space<vmem>>, vector<16x8xf32>,
    %137 = vector.extract_strided_slice %97 {offsets = [0, 8], sizes = [16, 8], strides = [1, 1]} : vector<16x20xf32> to vector<16x8xf32>
    %138 = arith.truncf %137 : vector<16x8xf32> to vector<16x8xbf16>
    %139 = vector.extract_strided_slice %102 {offsets = [0, 0, 1], sizes = [16, 16, 1], strides = [1, 1, 1]} : vector<16x16x2xf32> to vector<16x16x1xf32>
    %cst_55 = arith.constant dense<0.000000e+00> : vector<16x16xf32>
    %140 = vector.multi_reduction <add>, %139, %cst_55 [2] : vector<16x16x1xf32> to vector<16x16xf32>
    %141 = vector.extract_strided_slice %100 {offsets = [0, 1], sizes = [16, 1], strides = [1, 1]} : vector<16x2xf32> to vector<16x1xf32>
    %142 = vector.extract_strided_slice %101 {offsets = [1, 0], sizes = [1, 16], strides = [1, 1]} : vector<2x16xf32> to vector<1x16xf32>
    %143 = vector.broadcast %141 : vector<16x1xf32> to vector<16x16xf32>
    %144 = vector.broadcast %142 : vector<1x16xf32> to vector<16x16xf32>
    %145 = arith.addf %143, %144 : vector<16x16xf32>
    %146 = arith.addf %145, %140 : vector<16x16xf32>
    %cst_56 = arith.constant 0.000000e+00 : f32
    %147 = vector.broadcast %cst_56 : f32 to vector<16x16xf32>
    %148 = arith.cmpf oge, %146, %147 : vector<16x16xf32>
    %cst_57 = arith.constant 2.000000e-01 : f32
    %149 = vector.broadcast %cst_57 : f32 to vector<16x16xf32>
    %150 = arith.mulf %149, %146 : vector<16x16xf32>
    %151 = arith.select %148, %146, %150 : vector<16x16xi1>, vector<16x16xf32>
    %cst_58 = arith.constant -1.000000e+30 : f32
    %152 = vector.broadcast %cst_58 : f32 to vector<16x16xf32>
    %153 = arith.select %2, %151, %152 : vector<16x16xi1>, vector<16x16xf32>
    %cst_59 = arith.constant dense<0xFF800000> : vector<16xf32>
    %154 = vector.multi_reduction <maximumf>, %153, %cst_59 [1] : vector<16x16xf32> to vector<16xf32>
    %155 = vector.shape_cast %154 : vector<16xf32> to vector<16x1xf32>
    %156 = vector.broadcast %155 : vector<16x1xf32> to vector<16x16xf32>
    %157 = arith.subf %153, %156 : vector<16x16xf32>
    %158 = math.exp %157 : vector<16x16xf32>
    %cst_60 = arith.constant 0.000000e+00 : f32
    %159 = vector.broadcast %cst_60 : f32 to vector<16x16xf32>
    %160 = arith.select %2, %158, %159 : vector<16x16xi1>, vector<16x16xf32>
    %cst_61 = arith.constant dense<0.000000e+00> : vector<16xf32>
    %161 = vector.multi_reduction <add>, %160, %cst_61 [1] : vector<16x16xf32> to vector<16xf32>
    %162 = vector.shape_cast %161 : vector<16xf32> to vector<16x1xf32>
    %cst_62 = arith.constant 9.99999971E-10 : f32
    %163 = vector.broadcast %cst_62 : f32 to vector<16x1xf32>
    %164 = arith.maximumf %162, %163 : vector<16x1xf32>
    %165 = tpu.reciprocal %164 {approx = true} : vector<16x1xf32> -> vector<16x1xf32>
    %166 = vector.broadcast %165 : vector<16x1xf32> to vector<16x16xf32>
    %167 = arith.mulf %160, %166 : vector<16x16xf32>
    %168 = arith.truncf %167 : vector<16x16xf32> to vector<16x16xbf16>
    %cst_63 = arith.constant dense<0.000000e+00> : vector<16x8xf32>
    %169 = tpu.matmul %168, %138, %cst_63 {dimension_numbers = #tpu.dot_dimension_numbers<[1], [0], [0], [1], [0, 0, 1, 1], [], []>} : vector<16x16xbf16>, vector<16x8xbf16>, vector<16x8xf32> -> vector<16x8xf32>
    %c0_64 = arith.constant 0 : index
    %c8_65 = arith.constant 8 : index
    %170 = vector.load %arg11[%c0_64, %c8_65] : memref<16x16xf32, #tpu.memory_space<vmem>>, vector<16x8xf32>
    tpu.vector_store %arg11[%c0_64, %c8_65], %169 {strides = array<i32>} : memref<16x16xf32, #tpu.memory_space<vmem>>, vector<16x8xf32>,
    %c0_66 = arith.constant 0 : index
    %c0_67 = arith.constant 0 : index
    %171 = vector.load %arg11[%c0_66, %c0_67] : memref<16x16xf32, #tpu.memory_space<vmem>>, vector<16x16xf32>
    %172 = arith.truncf %171 : vector<16x16xf32> to vector<16x16xbf16>
    %c0_68 = arith.constant 0 : index
    %c0_69 = arith.constant 0 : index
    %173 = vector.load %arg3[%c0_68, %c0_69] : memref<2x16xbf16, #tpu.memory_space<vmem>>, vector<2x16xbf16>
    %cst_70 = arith.constant dense<0.000000e+00> : vector<2x16xf32>
    %174 = tpu.matmul %173, %172, %cst_70 {dimension_numbers = #tpu.dot_dimension_numbers<[1], [0], [0], [1], [0, 0, 1, 1], [], []>} : vector<2x16xbf16>, vector<16x16xbf16>, vector<2x16xf32> -> vector<2x16xf32>
    %175 = arith.truncf %174 : vector<2x16xf32> to vector<2x16xbf16>
    %c0_71 = arith.constant 0 : index
    %c0_72 = arith.constant 0 : index
    %176 = vector.load %arg8[%c0_71, %c0_72] : memref<16x3xbf16, #tpu.memory_space<vmem>>, vector<16x3xbf16>
    %cst_73 = arith.constant dense<0.000000e+00> : vector<2x3xf32>
    %177 = tpu.matmul %175, %176, %cst_73 {dimension_numbers = #tpu.dot_dimension_numbers<[1], [0], [0], [1], [0, 0, 1, 1], [], []>} : vector<2x16xbf16>, vector<16x3xbf16>, vector<2x3xf32> -> vector<2x3xf32>
    %c0_74 = arith.constant 0 : index
    %c0_75 = arith.constant 0 : index
    %178 = vector.load %arg9[%c0_74, %c0_75] : memref<1x3xf32, #tpu.memory_space<vmem>>, vector<1x3xf32>
    %179 = vector.broadcast %178 : vector<1x3xf32> to vector<2x3xf32>
    %180 = arith.addf %177, %179 : vector<2x3xf32>
    %cst_76 = arith.constant dense<0xFF800000> : vector<2xf32>
    %181 = vector.multi_reduction <maximumf>, %180, %cst_76 [1] : vector<2x3xf32> to vector<2xf32>
    %182 = vector.shape_cast %181 : vector<2xf32> to vector<2x1xf32>
    %183 = vector.broadcast %182 : vector<2x1xf32> to vector<2x3xf32>
    %184 = arith.subf %180, %183 : vector<2x3xf32>
    %185 = math.exp %184 : vector<2x3xf32>
    %cst_77 = arith.constant dense<0.000000e+00> : vector<2xf32>
    %186 = vector.multi_reduction <add>, %185, %cst_77 [1] : vector<2x3xf32> to vector<2xf32>
    %187 = vector.shape_cast %186 : vector<2xf32> to vector<2x1xf32>
    %188 = vector.broadcast %187 : vector<2x1xf32> to vector<2x3xf32>
    %189 = arith.divf %185, %188 : vector<2x3xf32>
    %c0_78 = arith.constant 0 : index
    %c0_79 = arith.constant 0 : index
    %190 = vector.load %arg10[%c0_78, %c0_79] : memref<2x3xf32, #tpu.memory_space<vmem>>, vector<2x3xf32>
    tpu.vector_store %arg10[%c0_78, %c0_79], %189 {strides = array<i32>} : memref<2x3xf32, #tpu.memory_space<vmem>>, vector<2x3xf32>,
    return
  }
}

</mosaic_0001>

<bundles_post_ra>
// kernel: tpu_custom_call.1
= control target key start
LH: loop header
LB: loop body
LE: loop exit
PB: predicated region body
PF: predicated region fallthrough
CT: control target
= control target key end

     0   :  { %vm86_vm0 = vcmask 1042432   ;;  %v4272_v2 = vmov 0.0   ;;  %vm4324_vm1 = vmmov 0   ;;  %vm82_vm2 = vcmask 48128   ;;  %s4259_s0 = inlined_call_operand.vmem [shape: bf16[16,6], index: 0, kind: input, shape index: {}]   ;;  %s4260_s1 = inlined_call_operand.vmem [shape: bf16[256,3], index: 1, kind: input, shape index: {}]   ;;  %s4261_s2 = inlined_call_operand.vmem [shape: f32[16,16], index: 2, kind: input, shape index: {}]   ;;  %s4262_s3 = inlined_call_operand.vmem [shape: bf16[2,16], index: 3, kind: input, shape index: {}]   ;;  %s4263_s4 = inlined_call_operand.vmem [shape: bf16[6,20], index: 4, kind: input, shape index: {}]   ;;  %s4264_s5 = inlined_call_operand.vmem [shape: bf16[3,10], index: 5, kind: input, shape index: {}]   ;;  %s4265_s6 = inlined_call_operand.vmem [shape: bf16[16,20], index: 6, kind: input, shape index: {}]   ;;  %s4266_s7 = inlined_call_operand.vmem [shape: bf16[8,2], index: 7, kind: input, shape index: {}]   ;;  %s4267_s8 = inlined_call_operand.vmem [shape: bf16[16,3], index: 8, kind: input, shape index: {}]   ;;  %s4268_s9 = inlined_call_operand.vmem [shape: f32[1,3], index: 9, kind: input, shape index: {}]   ;;  %s4269_s10 = inlined_call_operand.hbm [shape: f32[2,3], index: 10, kind: output, shape index: {}]  }
   0x1   :  { %v75_v0 = vld [vmem:[%s4263_s4] sm:$0x7]  ;;  %2717 = vmatprep.subr.bf16.mxu0 %v4272_v2  ;;  %2719 = vmatprep.mubr.msk.bf16.mxu0 %vm4324_vm1, %v4272_v2  ;;  %vm260_vm3 = vcmask 1040384   ;;  %vm261_vm4 = vcmask 1041408   ;;  %v3060_v6 = vmov 65535   ;;  %vm211_vm5 = vcmask 23552  }
   0x2   :  { %v2981_v1 = vld [vmem:[%s4259_s0] sm:$0xff]   ;;  %v88_v3 = vsel %vm86_vm0, %v75_v0, 0  ;;  %v262_v7 = vsel %vm260_vm3, 4294967295, %v3060_v6  ;;  %v4274_v10 = vmov 18   ;;  %v2983_v11 = vld [vmem:[%s4260_s1 + $0x8] sm:$0xff]   ;;  %v2984_v12 = vld [vmem:[%s4260_s1 + $0x10] sm:$0xff]  }
   0x3   :  { %2718 = vmatpush3.bf16.msra.mxu0 %v88_v3  ;;  %v76_v4 = vld [vmem:[%s4264_s5] sm:$0x3]  ;;  %v263_v8 = vsel %vm261_vm4, %v262_v7, 0  ;;  %2847 = vset.pattern.permute.xlu1 %v4274_v10  ;;  %v2985_v13 = vld [vmem:[%s4260_s1 + $0x18] sm:$0xff]  }
   0x4   :  { %v2982_v5 = vld [vmem:[%s4260_s1] sm:$0xff]   ;;  %2757 = vmatprep.subr.bf16.mxu0 %v4272_v2  ;;  %v265_v9 = vand.u32 %v263_v8, %v76_v4 }
   0x5   :  { %2725 = vmatprep.mubr.msk.bf16.mxu1 %vm211_vm5, %v2982_v5  ;;  %v2986_v14 = vld [vmem:[%s4260_s1 + $0x20] sm:$0xff]  }
   0x6   :  { %2720 = vmatmul.mubr.msk.bf16.vlgmr.msra.gmra.mxu0 %vm82_vm2, %v2981_v1  ;;  %2723 = vmatprep.subr.bf16.mxu1 %v265_v9 }
   0x7   :  { %2759 = vmatprep.mubr.msk.bf16.mxu0 %vm4324_vm1, %v4272_v2  ;;  %2724 = vmatpush3.bf16.msra.mxu1 %v265_v9 }
   0x8   :  { %2809 = vmatprep.subr.bf16.mxu1 %v4272_v2 }
   0xa   :  { %2726 = vmatmul.mubr.msk.bf16.vlgmr.msra.gmra.mxu1 %vm211_vm5, %v2983_v11 }
   0xb   :  { %2729 = vmatprep.mubr.msk.bf16.mxu1 %vm211_vm5, %v2984_v12 }
  0x12   :  { %2730 = vmatmul.mubr.msk.bf16.gmra.mxu1 %vm211_vm5, %v2985_v13 }
  0x13   :  { %2733 = vmatprep.mubr.msk.bf16.mxu1 %vm211_vm5, %v2986_v14 }
  0x14   :  { %15 = vsyncpa [#allocation4], 0  ;;  %v2987_v15 = vld [vmem:[%s4260_s1 + $0x28] sm:$0xff]   ;;  %v2988_v16 = vld [vmem:[%s4260_s1 + $0x30] sm:$0xff]   ;;  %v3062_v26 = vmov 8   ;;  %s3063_s25 = smov 112  }
  0x15   :  { %v2989_v17 = vld [vmem:[%s4260_s1 + $0x38] sm:$0xff]   ;;  %v2990_v18 = vld [vmem:[%s4260_s1 + $0x40] sm:$0xff]   ;;  %v2991_v19 = vld [vmem:[%s4260_s1 + $0x48] sm:$0xff]   ;;  %2849 = vset.pattern.permute.xlu0 %v3062_v26  ;;  %v4270_v31 = vmov 19   ;;  %v3065_v45 = vmov 9   ;;  %s3067_s11 = smov 8  }
  0x16   :  { %v2992_v20 = vld [vmem:[%s4260_s1 + $0x50] sm:$0xff]   ;;  %v2993_v21 = vld [vmem:[%s4260_s1 + $0x58] sm:$0xff]   ;;  %v2994_v22 = vld [vmem:[%s4260_s1 + $0x60] sm:$0xff]  }
  0x17   :  { %v2995_v23 = vld [vmem:[%s4260_s1 + $0x68] sm:$0xff]   ;;  %v2996_v24 = vld [vmem:[%s4260_s1 + $0x70] sm:$0xff]   ;;  %v2997_v25 = vld [vmem:[%s4260_s1 + $0x78] sm:$0xff]  }
  0x1a   :  { %2734 = vmatmul.mubr.msk.bf16.gmra.mxu1 %vm211_vm5, %v2987_v15 }
  0x1b   :  { %2737 = vmatprep.mubr.msk.bf16.mxu1 %vm211_vm5, %v2988_v16 }
  0x22   :  { %2738 = vmatmul.mubr.msk.bf16.gmra.mxu1 %vm211_vm5, %v2989_v17 }
  0x23   :  { %2741 = vmatprep.mubr.msk.bf16.mxu1 %vm211_vm5, %v2990_v18 }
  0x2a   :  { %2742 = vmatmul.mubr.msk.bf16.gmra.mxu1 %vm211_vm5, %v2991_v19 }
  0x2b   :  { %2745 = vmatprep.mubr.msk.bf16.mxu1 %vm211_vm5, %v2992_v20 }
  0x32   :  { %2746 = vmatmul.mubr.msk.bf16.gmra.mxu1 %vm211_vm5, %v2993_v21 }
  0x33   :  { %2749 = vmatprep.mubr.msk.bf16.mxu1 %vm211_vm5, %v2994_v22 }
  0x3a   :  { %2750 = vmatmul.mubr.msk.bf16.gmra.mxu1 %vm211_vm5, %v2995_v23 }
  0x3b   :  { %2753 = vmatprep.mubr.msk.bf16.mxu1 %vm211_vm5, %v2996_v24 }
  0x42   :  { %2754 = vmatmul.mubr.msk.bf16.gmra.mxu1 %vm211_vm5, %v2997_v25 }
  0x43   :  { %2811 = vmatprep.mubr.msk.bf16.mxu1 %vm4324_vm1, %v4272_v2 }
  0xc6   :  { %v124_v27 = vpop.f32.mrf.mxu0 }
  0xc7   :  { %502 = vperm.xlu1 %2847, %v124_v27   ;;  %430 = vrot.lane.b32.xlu0 %v124_v27, %s3063_s25 }
  0xc8   :  { %v2721_v28 = vpop.f32.mrf.mxu0 }
  0xca   :  { %v3211_v29 = vpop.f32.mrf.mxu0  ;;  %v2727_v32 = vpop.f32.mrf.mxu1 }
  0xcb   :  { %v3214_v30 = vpack.c.bf16 %v3211_v29, %v124_v27  ;;  %2848 = vset.pattern.permute.xlu1 %v4270_v31  ;;  %432 = vrot.lane.b32.xlu0 %v3211_v29, %s3063_s25  ;;  %v1307_v34 = vmul.f32 0.01, %v2727_v32  ;;  %vm1275_vm6 = vcmp.ge.f32.partialorder %v2727_v32, 0.0 }
  0xcc   :  { %900 = vperm.xlu1 %2848, %v124_v27   ;;  %v2722_v33 = vpop.f32.mrf.mxu0  ;;  %v301_v35 = vpop.f32.mrf.mxu1 }
  0xcd   :  { %4328 = vst [vmem:[#allocation6_spill] sm:$0xff] %v3214_v30  ;;  %2758 = vmatpush3.bf16.msra.mxu0 %v3214_v30  ;;  %v3222_v38 = vsel %vm1275_vm6, %v2727_v32, %v1307_v34  ;;  %v1305_v39 = vmul.f32 0.01, %v301_v35  ;;  %vm1273_vm8 = vcmp.ge.f32.partialorder %v301_v35, 0.0 }
  0xce   :  { %2763 = vmatprep.subr.bf16.mxu0 %v4272_v2  ;;  %v2728_v36 = vpop.f32.mrf.mxu1  ;;  %4329 = vst [vmem:[#allocation7_spill] sm:$0xff] %v3222_v38 }
  0xcf   :  { %554 = vperm.xlu0 %2849, %v2727_v32   ;;  %vm1276_vm7 = vcmp.ge.f32.partialorder %v2728_v36, 0.0  ;;  %v1308_v37 = vmul.f32 0.01, %v2728_v36  ;;  %v3241_v48 = vsel %vm1273_vm8, %v301_v35, %v1305_v39  ;;  %vm791_vm8 = vcmask 1041409  }
  0xd0   :  { %2852 = vset.pattern.permute.xlu1 %v3062_v26  ;;  %v3224_v40 = vpop.f32.mrf.mxu1  ;;  %4331 = vst [vmem:[#allocation9_spill] sm:$0xff] %v3241_v48 }
  0xd1   :  { %548 = vperm.xlu1 %2852, %v301_v35   ;;  %v3226_v41 = vsel %vm1276_vm7, %v2728_v36, %v1308_v37  ;;  %vm1274_vm9 = vcmp.ge.f32.partialorder %v3224_v40, 0.0  ;;  %v1306_v42 = vmul.f32 0.01, %v3224_v40  ;;  %vm654_vm7 = vcmask 130112  }
  0xd2   :  { %4330 = vst [vmem:[#allocation8_spill] sm:$0xff] %v3226_v41  ;;  %v3234_v44 = vpop.f32.mrf.mxu1 }
  0xd3   :  { %2850 = vset.pattern.permute.xlu0 %v4274_v10  ;;  %v1311_v46 = vmul.f32 0.01, %v3234_v44  ;;  %vm1279_vm10 = vcmp.ge.f32.partialorder %v3234_v44, 0.0  ;;  %v3244_v49 = vsel %vm1274_vm9, %v3224_v40, %v1306_v42  ;;  %vm793_vm9 = vcmask 1042434  }
  0xd4   :  { %506 = vperm.xlu0 %2850, %v3211_v29   ;;  %v3239_v47 = vpop.f32.mrf.mxu1  ;;  %4332 = vst [vmem:[#allocation10_spill] sm:$0xff] %v3244_v49 }
  0xd5   :  { %2853 = vset.pattern.permute.xlu1 %v3065_v45  ;;  %v1309_v50 = vmul.f32 0.01, %v3239_v47  ;;  %vm1277_vm11 = vcmp.ge.f32.partialorder %v3239_v47, 0.0  ;;  %v3252_v54 = vsel %vm1279_vm10, %v3234_v44, %v1311_v46  ;;  %vm795_vm10 = vcmask 1043459  }
  0xd6   :  { %914 = vperm.xlu1 %2853, %v301_v35   ;;  %v2732_v52 = vpop.f32.mrf.mxu1  ;;  %4333 = vst [vmem:[#allocation11_spill] sm:$0xff] %v3252_v54 }
  0xd7   :  { %vm1280_vm12 = vcmp.ge.f32.partialorder %v2732_v52, 0.0  ;;  %v1312_v53 = vmul.f32 0.01, %v2732_v52  ;;  %v3256_v57 = vsel %vm1277_vm11, %v3239_v47, %v1309_v50  ;;  %vm797_vm11 = vcmask 1044484  }
  0xd8   :  { %2851 = vset.pattern.permute.xlu0 %v3065_v45  ;;  %v320_v55 = vpop.f32.mrf.mxu1  ;;  %4334 = vst [vmem:[#allocation12_spill] sm:$0xff] %v3256_v57 }
  0xd9   :  { %920 = vperm.xlu0 %2851, %v2727_v32   ;;  %vm1278_vm13 = vcmp.ge.f32.partialorder %v320_v55, 0.0  ;;  %v1310_v56 = vmul.f32 0.01, %v320_v55  ;;  %v3258_v58 = vsel %vm1280_vm12, %v2732_v52, %v1312_v53  ;;  %vm799_vm12 = vcmask 1045509  }
  0xda   :  { %2854 = vset.pattern.permute.xlu1 %v3062_v26  ;;  %4335 = vst [vmem:[#allocation13_spill] sm:$0xff] %v3258_v58  ;;  %v3260_v59 = vpop.f32.mrf.mxu1 }
  0xdb   :  { %557 = vperm.xlu1 %2854, %v2728_v36   ;;  %v1315_v61 = vmul.f32 0.01, %v3260_v59  ;;  %v3266_v62 = vsel %vm1278_vm13, %v320_v55, %v1310_v56  ;;  %vm1283_vm14 = vcmp.ge.f32.partialorder %v3260_v59, 0.0  ;;  %vm801_vm13 = vcmask 1046534  }
  0xdc   :  { %4336 = vst [vmem:[#allocation14_spill] sm:$0xff] %v3266_v62  ;;  %v3269_v63 = vpop.f32.mrf.mxu1 }
  0xdd   :  { %2862 = vset.pattern.permute.xlu0 %v3062_v26  ;;  %v1313_v1 = vmul.f32 0.01, %v3269_v63  ;;  %vm1281_vm15 = vcmp.ge.f32.partialorder %v3269_v63, 0.0  ;;  %v3277_v5 = vsel %vm1283_vm14, %v3260_v59, %v1315_v61  ;;  %vm803_vm14 = vcmask 1047559  }
  0xde   :  { %569 = vperm.xlu0 %2862, %v2732_v52   ;;  %v2736_v3 = vpop.f32.mrf.mxu1  ;;  %4337 = vst [vmem:[#allocation15_spill] sm:$0xff] %v3277_v5 }
  0xdf   :  { %2855 = vset.pattern.permute.xlu1 %v3065_v45  ;;  %vm1284_vm0 = vcmp.ge.f32.partialorder %v2736_v3, 0.0  ;;  %v1316_v4 = vmul.f32 0.01, %v2736_v3  ;;  %v3281_v8 = vsel %vm1281_vm15, %v3269_v63, %v1313_v1 }
  0xe0   :  { %923 = vperm.xlu1 %2855, %v2728_v36   ;;  %v336_v6 = vpop.f32.mrf.mxu1  ;;  %4338 = vst [vmem:[#allocation16_spill] sm:$0xff] %v3281_v8 }
  0xe1   :  { %vm1282_vm2 = vcmp.ge.f32.partialorder %v336_v6, 0.0  ;;  %v1314_v7 = vmul.f32 0.01, %v336_v6  ;;  %v3283_v9 = vsel %vm1284_vm0, %v2736_v3, %v1316_v4 }
  0xe2   :  { %2863 = vset.pattern.permute.xlu0 %v3065_v45  ;;  %4339 = vst [vmem:[#allocation17_spill] sm:$0xff] %v3283_v9  ;;  %v3286_v11 = vpop.f32.mrf.mxu1 }
  0xe3   :  { %935 = vperm.xlu0 %2863, %v2732_v52   ;;  %v1319_v13 = vmul.f32 0.01, %v3286_v11  ;;  %v3292_v14 = vsel %vm1282_vm2, %v336_v6, %v1314_v7  ;;  %vm1287_vm3 = vcmp.ge.f32.partialorder %v3286_v11, 0.0 }
  0xe4   :  { %2856 = vset.pattern.permute.xlu1 %v3062_v26  ;;  %4340 = vst [vmem:[#allocation18_spill] sm:$0xff] %v3292_v14  ;;  %v3295_v15 = vpop.f32.mrf.mxu1  ;;  %v509_v14 = vlaneseq }
  0xe5   :  { %551 = vperm.xlu1 %2856, %v3224_v40   ;;  %v1317_v17 = vmul.f32 0.01, %v3295_v15  ;;  %vm1285_vm4 = vcmp.ge.f32.partialorder %v3295_v15, 0.0  ;;  %v3304_v20 = vsel %vm1287_vm3, %v3286_v11, %v1319_v13 }
  0xe6   :  { %v2740_v18 = vpop.f32.mrf.mxu1  ;;  %4341 = vst [vmem:[#allocation19_spill] sm:$0xff] %v3304_v20  ;;  %v644_v58 = vand.u32 127, %v509_v14  ;;  %v3563_v38 = vshrl.u32 %v509_v14, 7 }
  0xe7   :  { %2864 = vset.pattern.permute.xlu0 %v3062_v26  ;;  %vm1288_vm5 = vcmp.ge.f32.partialorder %v2740_v18, 0.0  ;;  %v1320_v19 = vmul.f32 0.01, %v2740_v18  ;;  %v3308_v23 = vsel %vm1285_vm4, %v3295_v15, %v1317_v17  ;;  %vm4327_vm4 = vcmask 130048  }
  0xe8   :  { %563 = vperm.xlu0 %2864, %v320_v55   ;;  %v352_v21 = vpop.f32.mrf.mxu1  ;;  %4342 = vst [vmem:[#allocation20_spill] sm:$0xff] %v3308_v23  ;;  %v649_v62 = vadd.s32 4294967288, %v644_v58  ;;  %v3573_v30 = vsub.s32 %v644_v58, %v3563_v38 }
  0xe9   :  { %2857 = vset.pattern.permute.xlu1 %v3065_v45  ;;  %vm1286_vm6 = vcmp.ge.f32.partialorder %v352_v21, 0.0  ;;  %v1318_v22 = vmul.f32 0.01, %v352_v21  ;;  %v3310_v24 = vsel %vm1288_vm5, %v2740_v18, %v1320_v19 }
  0xea   :  { %917 = vperm.xlu1 %2857, %v3224_v40   ;;  %4343 = vst [vmem:[#allocation21_spill] sm:$0xff] %v3310_v24  ;;  %v3340_v32 = vpop.f32.mrf.mxu1  ;;  %v3568_v48 = vsub.s32 %v649_v62, %v3563_v38 }
  0xeb   :  { %v3315_v27 = vsel %vm1286_vm6, %v352_v21, %v1318_v22  ;;  %4345 = vst [vmem:[#allocation23_spill] sm:$0xff] %v3340_v32 }
  0xec   :  { %2865 = vset.pattern.permute.xlu0 %v3065_v45  ;;  %4344 = vst [vmem:[#allocation22_spill] sm:$0xff] %v3315_v27  ;;  %v3344_v33 = vpop.f32.mrf.mxu1 }
  0xed   :  { %929 = vperm.xlu0 %2865, %v320_v55   ;;  %4346 = vst [vmem:[#allocation24_spill] sm:$0xff] %v3344_v33 }
  0xee   :  { %2858 = vset.pattern.permute.xlu1 %v3062_v26  ;;  %v3349_v34 = vpop.f32.mrf.mxu1 }
  0xef   :  { %566 = vperm.xlu1 %2858, %v3234_v44   ;;  %4347 = vst [vmem:[#allocation25_spill] sm:$0xff] %v3349_v34 }
  0xf0   :  { %v3359_v35 = vpop.f32.mrf.mxu1 }
  0xf1   :  { %2870 = vset.pattern.permute.xlu0 %v3062_v26  ;;  %4348 = vst [vmem:[#allocation26_spill] sm:$0xff] %v3359_v35 }
  0xf2   :  { %581 = vperm.xlu0 %2870, %v2736_v3   ;;  %v3362_v36 = vpop.f32.mrf.mxu1 }
  0xf3   :  { %2859 = vset.pattern.permute.xlu1 %v3065_v45  ;;  %4349 = vst [vmem:[#allocation27_spill] sm:$0xff] %v3362_v36 }
  0xf4   :  { %932 = vperm.xlu1 %2859, %v3234_v44   ;;  %v3367_v37 = vpop.f32.mrf.mxu1 }
  0xf5   :  { %4350 = vst [vmem:[#allocation28_spill] sm:$0xff] %v3367_v37 }
  0xf6   :  { %2871 = vset.pattern.permute.xlu0 %v3065_v45  ;;  %v3373_v39 = vpop.f32.mrf.mxu1 }
  0xf7   :  { %947 = vperm.xlu0 %2871, %v2736_v3   ;;  %4351 = vst [vmem:[#allocation29_spill] sm:$0xff] %v3373_v39 }
  0xf8   :  { %2860 = vset.pattern.permute.xlu1 %v3062_v26  ;;  %v3383_v40 = vpop.f32.mrf.mxu1 }
  0xf9   :  { %560 = vperm.xlu1 %2860, %v3239_v47   ;;  %4352 = vst [vmem:[#allocation30_spill] sm:$0xff] %v3383_v40 }
  0xfa   :  { %v3386_v42 = vpop.f32.mrf.mxu1 }
  0xfb   :  { %2872 = vset.pattern.permute.xlu0 %v3062_v26  ;;  %4353 = vst [vmem:[#allocation31_spill] sm:$0xff] %v3386_v42 }
  0xfc   :  { %575 = vperm.xlu0 %2872, %v336_v6   ;;  %v3391_v44 = vpop.f32.mrf.mxu1 }
  0xfd   :  { %2861 = vset.pattern.permute.xlu1 %v3065_v45  ;;  %4354 = vst [vmem:[#allocation32_spill] sm:$0xff] %v3391_v44 }
  0xfe   :  { %926 = vperm.xlu1 %2861, %v3239_v47   ;;  %v3397_v46 = vpop.f32.mrf.mxu1 }
  0xff   :  { %4355 = vst [vmem:[#allocation33_spill] sm:$0xff] %v3397_v46 }
 0x100   :  { %2873 = vset.pattern.permute.xlu0 %v3065_v45  ;;  %v3411_v52 = vpop.f32.mrf.mxu1 }
 0x101   :  { %941 = vperm.xlu0 %2873, %v336_v6   ;;  %4358 = vst [vmem:[#allocation36_spill] sm:$0xff] %v3411_v52 }
 0x102   :  { %2866 = vset.pattern.permute.xlu1 %v3062_v26  ;;  %v3414_v53 = vpop.f32.mrf.mxu1 }
 0x103   :  { %578 = vperm.xlu1 %2866, %v3260_v59   ;;  %4359 = vst [vmem:[#allocation37_spill] sm:$0xff] %v3414_v53 }
 0x104   :  { %v3421_v56 = vpop.f32.mrf.mxu1 }
 0x105   :  { %2878 = vset.pattern.permute.xlu0 %v3062_v26  ;;  %4360 = vst [vmem:[#allocation38_spill] sm:$0xff] %v3421_v56 }
 0x106   :  { %593 = vperm.xlu0 %2878, %v2740_v18   ;;  %v3429_v61 = vpop.f32.mrf.mxu1 }
 0x107   :  { %2867 = vset.pattern.permute.xlu1 %v3065_v45  ;;  %4361 = vst [vmem:[#allocation39_spill] sm:$0xff] %v3429_v61 }
 0x108   :  { %944 = vperm.xlu1 %2867, %v3260_v59   ;;  %v3441_v1 = vpop.f32.mrf.mxu1 }
 0x109   :  { %4362 = vst [vmem:[#allocation40_spill] sm:$0xff] %v3441_v1 }
 0x10a   :  { %2879 = vset.pattern.permute.xlu0 %v3065_v45 }
 0x10b   :  { %959 = vperm.xlu0 %2879, %v2740_v18  }
 0x10c   :  { %2868 = vset.pattern.permute.xlu1 %v3062_v26 }
 0x10d   :  { %572 = vperm.xlu1 %2868, %v3269_v63  }
 0x10f   :  { %2880 = vset.pattern.permute.xlu0 %v3062_v26 }
 0x110   :  { %587 = vperm.xlu0 %2880, %v352_v21  }
 0x111   :  { %2869 = vset.pattern.permute.xlu1 %v3065_v45 }
 0x112   :  { %938 = vperm.xlu1 %2869, %v3269_v63  }
 0x114   :  { %2881 = vset.pattern.permute.xlu0 %v3065_v45 }
 0x115   :  { %953 = vperm.xlu0 %2881, %v352_v21  }
 0x116   :  { %2874 = vset.pattern.permute.xlu1 %v3062_v26 }
 0x117   :  { %590 = vperm.xlu1 %2874, %v3286_v11  }
 0x119   :  { %2886 = vset.pattern.permute.xlu0 %v3062_v26 }
 0x11a   :  { %605 = vperm.xlu0 %2886, %v3349_v34  }
 0x11b   :  { %2875 = vset.pattern.permute.xlu1 %v3065_v45 }
 0x11c   :  { %956 = vperm.xlu1 %2875, %v3286_v11  }
 0x11e   :  { %2887 = vset.pattern.permute.xlu0 %v3065_v45 }
 0x11f   :  { %971 = vperm.xlu0 %2887, %v3349_v34  }
 0x120   :  { %2876 = vset.pattern.permute.xlu1 %v3062_v26 }
 0x121   :  { %584 = vperm.xlu1 %2876, %v3295_v15  }
 0x123   :  { %2888 = vset.pattern.permute.xlu0 %v3062_v26 }
 0x124   :  { %599 = vperm.xlu0 %2888, %v3359_v35  }
 0x125   :  { %2877 = vset.pattern.permute.xlu1 %v3065_v45 }
 0x126   :  { %950 = vperm.xlu1 %2877, %v3295_v15  }
 0x128   :  { %2889 = vset.pattern.permute.xlu0 %v3065_v45 }
 0x129   :  { %965 = vperm.xlu0 %2889, %v3359_v35  }
 0x12a   :  { %2882 = vset.pattern.permute.xlu1 %v3062_v26 }
 0x12b   :  { %602 = vperm.xlu1 %2882, %v3340_v32  }
 0x12d   :  { %2894 = vset.pattern.permute.xlu0 %v3062_v26 }
 0x12e   :  { %617 = vperm.xlu0 %2894, %v3373_v39  }
 0x12f   :  { %2883 = vset.pattern.permute.xlu1 %v3065_v45 }
 0x130   :  { %968 = vperm.xlu1 %2883, %v3340_v32  }
 0x132   :  { %2895 = vset.pattern.permute.xlu0 %v3065_v45 }
 0x133   :  { %983 = vperm.xlu0 %2895, %v3373_v39  }
 0x134   :  { %2884 = vset.pattern.permute.xlu1 %v3062_v26 }
 0x135   :  { %596 = vperm.xlu1 %2884, %v3344_v33  }
 0x137   :  { %2896 = vset.pattern.permute.xlu0 %v3062_v26 }
 0x138   :  { %611 = vperm.xlu0 %2896, %v3383_v40  }
 0x139   :  { %2885 = vset.pattern.permute.xlu1 %v3065_v45  ;;  %v431_v4 = vpop.permute.xlu0 %430 }
 0x13a   :  { %962 = vperm.xlu1 %2885, %v3344_v33  }
 0x13c   :  { %2897 = vset.pattern.permute.xlu0 %v3065_v45 }
 0x13d   :  { %977 = vperm.xlu0 %2897, %v3383_v40   ;;  %v433_v7 = vpop.permute.xlu0 %432 }
 0x13e   :  { %2890 = vset.pattern.permute.xlu1 %v3062_v26 }
 0x13f   :  { %614 = vperm.xlu1 %2890, %v3362_v36  }
 0x141   :  { %2902 = vset.pattern.permute.xlu0 %v3062_v26 }
 0x142   :  { %v3400_v47 = vpop.permute.xlu1 %502  ;;  %629 = vperm.xlu0 %2902, %v3397_v46  }
 0x143   :  { %4356 = vst [vmem:[#allocation34_spill] sm:$0xff] %v3400_v47  ;;  %2891 = vset.pattern.permute.xlu1 %v3065_v45 }
 0x144   :  { %980 = vperm.xlu1 %2891, %v3362_v36  }
 0x146   :  { %2903 = vset.pattern.permute.xlu0 %v3065_v45 }
 0x147   :  { %v3406_v50 = vpop.permute.xlu1 %900  ;;  %995 = vperm.xlu0 %2903, %v3397_v46  }
 0x148   :  { %4357 = vst [vmem:[#allocation35_spill] sm:$0xff] %v3406_v50  ;;  %2892 = vset.pattern.permute.xlu1 %v3062_v26 }
 0x149   :  { %608 = vperm.xlu1 %2892, %v3367_v37  }
 0x14a   :  { %v3461_v13 = vpop.permute.xlu0 %554 }
 0x14b   :  { %2904 = vset.pattern.permute.xlu0 %v3062_v26 }
 0x14c   :  { %v3416_v55 = vpop.permute.xlu1 %548  ;;  %623 = vperm.xlu0 %2904, %v3411_v52  }
 0x14d   :  { %2893 = vset.pattern.permute.xlu1 %v3065_v45  ;;  %v648_v14 = vrot.slane %v3416_v55, %v3573_v30  ;;  %v659_v55 = vrot.slane %v3461_v13, %v3573_v30 }
 0x14e   :  { %974 = vperm.xlu1 %2893, %v3367_v37  }
 0x14f   :  { %v3468_v17 = vpop.permute.xlu0 %506 }
 0x150   :  { %2905 = vset.pattern.permute.xlu0 %v3065_v45  ;;  %4363 = vst [vmem:[#allocation41_spill] sm:$0xff] %v3468_v17 }
 0x151   :  { %989 = vperm.xlu0 %2905, %v3411_v52   ;;  %v3425_v59 = vpop.permute.xlu1 %914 }
 0x152   :  { %2898 = vset.pattern.permute.xlu1 %v3062_v26 }
 0x153   :  { %626 = vperm.xlu1 %2898, %v3386_v42  }
 0x155   :  { %2910 = vset.pattern.permute.xlu0 %v3062_v26 }
 0x156   :  { %641 = vperm.xlu0 %2910, %v3429_v61   ;;  %v3434_v63 = vpop.permute.xlu1 %557 }
 0x157   :  { %2899 = vset.pattern.permute.xlu1 %v3065_v45  ;;  %v663_v62 = vrot.slane %v3434_v63, %v3568_v48  ;;  %v1012_v63 = vrot.slane %v3425_v59, %v3573_v30 }
 0x158   :  { %992 = vperm.xlu1 %2899, %v3386_v42  }
 0x159   :  { %v664_v13 = vsel %vm654_vm7, %v663_v62, %v659_v55 }
 0x15a   :  { %2911 = vset.pattern.permute.xlu0 %v3065_v45 }
 0x15b   :  { %1007 = vperm.xlu0 %2911, %v3429_v61   ;;  %v3443_v3 = vpop.permute.xlu1 %923 }
 0x15c   :  { %2900 = vset.pattern.permute.xlu1 %v3062_v26 }
 0x15d   :  { %620 = vperm.xlu1 %2900, %v3391_v44  }
 0x15f   :  { %2912 = vset.pattern.permute.xlu0 %v3062_v26 }
 0x160   :  { %635 = vperm.xlu0 %2912, %v3441_v1   ;;  %v3449_v6 = vpop.permute.xlu1 %551 }
 0x161   :  { %2901 = vset.pattern.permute.xlu1 %v3065_v45  ;;  %v653_v50 = vrot.slane %v3449_v6, %v3568_v48  ;;  %v1025_v6 = vrot.slane %v3443_v3, %v3568_v48 }
 0x162   :  { %986 = vperm.xlu1 %2901, %v3391_v44   ;;  %v4364_v44 = vmov 18  }
 0x164   :  { %2913 = vset.pattern.permute.xlu0 %v3065_v45 }
 0x165   :  { %1001 = vperm.xlu0 %2913, %v3441_v1   ;;  %v3456_v11 = vpop.permute.xlu1 %917 }
 0x166   :  { %2906 = vset.pattern.permute.xlu1 %v3062_v26  ;;  %v1016_v47 = vrot.slane %v3456_v11, %v3568_v48  ;;  %v655_v11 = vsel %vm654_vm7, %v653_v50, %v648_v14 }
 0x167   :  { %638 = vperm.xlu1 %2906, %v3414_v53  }
 0x168   :  { %v1017_v50 = vsel %vm654_vm7, %v1016_v47, %v1012_v63 }
 0x169   :  { %2914 = vset.pattern.permute.xlu0 %v4270_v31 }
 0x16a   :  { %904 = vperm.xlu0 %2914, %v3211_v29   ;;  %v3464_v15 = vpop.permute.xlu1 %566  ;;  %v3474_v29 = vpop.permute.xlu0 %920 }
 0x16b   :  { %2907 = vset.pattern.permute.xlu1 %v3065_v45  ;;  %v1021_v3 = vrot.slane %v3474_v29, %v3573_v30  ;;  %v677_v14 = vrot.slane %v3464_v15, %v3573_v30 }
 0x16c   :  { %1004 = vperm.xlu1 %2907, %v3414_v53  }
 0x16d   :  { %v1026_v29 = vsel %vm654_vm7, %v1025_v6, %v1021_v3 }
 0x16e   :  { %2915 = vset.pattern.permute.xlu0 %v4274_v10  ;;  %v3478_v21 = vpop.permute.xlu0 %569  ;;  %v1153_v62 = vsel %vm791_vm8, %v1026_v29, %v1017_v50 }
 0x16f   :  { %v3471_v18 = vpop.permute.xlu1 %932  ;;  %v681_v59 = vrot.slane %v3478_v21, %v3568_v48 }
 0x170   :  { %2908 = vset.pattern.permute.xlu1 %v3062_v26  ;;  %v1039_v47 = vrot.slane %v3471_v18, %v3573_v30 }
 0x171   :  { %632 = vperm.xlu1 %2908, %v3421_v56  }
 0x172   :  { %v3482_v31 = vpop.permute.xlu0 %935 }
 0x174   :  { %v3476_v19 = vpop.permute.xlu1 %560 }
 0x175   :  { %2909 = vset.pattern.permute.xlu1 %v3065_v45  ;;  %v668_v17 = vrot.slane %v3476_v19, %v3573_v30 }
 0x176   :  { %998 = vperm.xlu1 %2909, %v3421_v56   ;;  %v3486_v25 = vpop.permute.xlu0 %563 }
 0x179   :  { %v3480_v22 = vpop.permute.xlu1 %926 }
 0x17a   :  { %v3490_v45 = vpop.permute.xlu0 %929  ;;  %v1030_v19 = vrot.slane %v3480_v22, %v3573_v30 }
 0x17e   :  { %v3484_v26 = vpop.permute.xlu1 %578  ;;  %v3492_v12 = vpop.permute.xlu0 %581 }
 0x17f   :  { %v699_v6 = vrot.slane %v3492_v12, %v3568_v48 }
 0x182   :  { %v3496_v60 = vpop.permute.xlu0 %947 }
 0x183   :  { %v3488_v28 = vpop.permute.xlu1 %944 }
 0x186   :  { %v3500_v43 = vpop.permute.xlu0 %575 }
 0x188   :  { %v3494_v16 = vpop.permute.xlu1 %572 }
 0x18a   :  { %v3504_v2 = vpop.permute.xlu0 %941 }
 0x18b   :  { %v1052_v18 = vrot.slane %v3504_v2, %v3568_v48 }
 0x18d   :  { %v3498_v0 = vpop.permute.xlu1 %938 }
 0x18e   :  { %v3508_v61 = vpop.permute.xlu0 %593  ;;  %v1048_v15 = vrot.slane %v3498_v0, %v3573_v30  ;;  %v1057_v0 = vrot.slane %v3488_v28, %v3573_v30 }
 0x190   :  { %v1053_v3 = vsel %vm654_vm7, %v1052_v18, %v1048_v15 }
 0x192   :  { %v3502_v51 = vpop.permute.xlu1 %590  ;;  %v3512_v1 = vpop.permute.xlu0 %959 }
 0x193   :  { %v1079_v50 = vrot.slane %v3512_v1, %v3568_v48  ;;  %v3803_v1 = vld [vmem:[%s4261_s2] sm:$0xff] }
 0x194   :  { %vm39_vm0 = vcmp.gt.f32.partialorder %v3803_v1, 0.5 }
 0x196   :  { %v3516_v46 = vpop.permute.xlu0 %587 }
 0x197   :  { %v3506_v10 = vpop.permute.xlu1 %956 }
 0x19a   :  { %v3520_v42 = vpop.permute.xlu0 %953 }
 0x19c   :  { %v3510_v53 = vpop.permute.xlu1 %584 }
 0x19f   :  { %436 = vxpose.xlu1.b32.start [1/2] (short) (narrow) %v431_v4, 8 }
 0x1a1   :  { %v3514_v56 = vpop.permute.xlu1 %950 }
 0x1a3   :  { %437 = vxpose.xlu1.b32.end [2/2] (short) (narrow) %v433_v7, 8  ;;  %v3524_v7 = vpop.permute.xlu0 %605 }
 0x1a6   :  { %v3518_v4 = vpop.permute.xlu1 %602 }
 0x1a7   :  { %v3529_v36 = vpop.permute.xlu0 %971 }
 0x1ab   :  { %v3522_v52 = vpop.permute.xlu1 %968  ;;  %v3533_v24 = vpop.permute.xlu0 %599 }
 0x1af   :  { %v3537_v37 = vpop.permute.xlu0 %965 }
 0x1b0   :  { %v3527_v39 = vpop.permute.xlu1 %596 }
 0x1b3   :  { %v3539_v34 = vpop.permute.xlu0 %617 }
 0x1b5   :  { %v3531_v20 = vpop.permute.xlu1 %962 }
 0x1b7   :  { %v3543_v23 = vpop.permute.xlu0 %983 }
 0x1ba   :  { %v3535_v40 = vpop.permute.xlu1 %614 }
 0x1bf   :  { %v3541_v32 = vpop.permute.xlu1 %980 }
 0x1c1   :  { %2916 = vset.pattern.permute.xlu1 %v4364_v44  ;;  %v3547_v44 = vpop.permute.xlu0 %611 }
 0x1c4   :  { %v3545_v27 = vpop.permute.xlu1 %608 }
 0x1c5   :  { %v3551_v9 = vpop.permute.xlu0 %977 }
 0x1c9   :  { %v3549_v5 = vpop.permute.xlu1 %974  ;;  %v3555_v33 = vpop.permute.xlu0 %629 }
 0x1cd   :  { %v3559_v54 = vpop.permute.xlu0 %995 }
 0x1ce   :  { %v3553_v35 = vpop.permute.xlu1 %626  ;;  %4367 = vst [vmem:[#allocation44_spill] sm:$0xff] %v3559_v54  ;;  %v672_v54 = vrot.slane %v3486_v25, %v3568_v48  ;;  %v1034_v25 = vrot.slane %v3490_v45, %v3568_v48  ;;  %v792_v45 = vsel %vm791_vm8, %v664_v13, %v655_v11  ;;  %v909_v13 = vsub.s32 1, %v3563_v38 }
 0x1cf   :  { %4365 = vst [vmem:[#allocation42_spill] sm:$0xff] %v3553_v35  ;;  %v686_v35 = vrot.slane %v3494_v16, %v3573_v30  ;;  %v690_v16 = vrot.slane %v3500_v43, %v3568_v48 }
 0x1d0   :  { %v673_v22 = vsel %vm654_vm7, %v672_v54, %v668_v17  ;;  %v1035_v54 = vsel %vm654_vm7, %v1034_v25, %v1030_v19  ;;  %v1043_v17 = vrot.slane %v3482_v31, %v3568_v48  ;;  %v695_v19 = vrot.slane %v3484_v26, %v3573_v30 }
 0x1d1   :  { %v3565_v41 = vpop.permute.xlu0 %623  ;;  %v794_v21 = vsel %vm793_vm9, %v673_v22, %v792_v45  ;;  %v691_v43 = vsel %vm654_vm7, %v690_v16, %v686_v35  ;;  %v682_v31 = vsel %vm654_vm7, %v681_v59, %v677_v14  ;;  %v1154_v55 = vsel %vm793_vm9, %v1035_v54, %v1153_v62 }
 0x1d2   :  { %v796_v11 = vsel %vm795_vm10, %v682_v31, %v794_v21  ;;  %v1044_v12 = vsel %vm654_vm7, %v1043_v17, %v1039_v47  ;;  %v1061_v35 = vrot.slane %v3496_v60, %v3568_v48  ;;  %v700_v2 = vsel %vm654_vm7, %v699_v6, %v695_v19 }
 0x1d3   :  { %v3557_v8 = vpop.permute.xlu1 %992  ;;  %v798_v26 = vsel %vm797_vm11, %v691_v43, %v796_v11  ;;  %v1155_v28 = vsel %vm795_vm10, %v1044_v12, %v1154_v55  ;;  %v511_v22 = vsub.s32 0, %v3563_v38  ;;  %v717_v60 = vrot.slane %v3508_v61, %v3568_v48  ;;  %v4375_v61 = vld [vmem:[#allocation35_spill] sm:$0xff] }
 0x1d4   :  { %4366 = vst [vmem:[#allocation43_spill] sm:$0xff] %v3557_v8  ;;  %v3654_v59 = vsel %vm654_vm7, %v1061_v35, %v1057_v0  ;;  %v708_v14 = vrot.slane %v3516_v46, %v3568_v48  ;;  %v3663_v29 = vsel %vm797_vm11, %v1053_v3, %v1155_v28  ;;  %v1070_v45 = vrot.slane %v3520_v42, %v3568_v48 }
 0x1d5   :  { %v3585_v58 = vpop.permute.xlu0 %989  ;;  %v704_v54 = vrot.slane %v3510_v53, %v3573_v30  ;;  %v3670_v16 = vsel %vm799_vm12, %v700_v2, %v798_v26  ;;  %v713_v17 = vrot.slane %v3502_v51, %v3573_v30  ;;  %v735_v47 = vrot.slane %v3524_v7, %v3568_v48 }
 0x1d6   :  { %v722_v46 = vrot.slane %v3527_v39, %v3573_v30  ;;  %v1084_v21 = vrot.slane %v3531_v20, %v3573_v30  ;;  %v1075_v42 = vrot.slane %v3506_v10, %v3573_v30  ;;  %v726_v53 = vrot.slane %v3533_v24, %v3568_v48  ;;  %v3798_v10 = vld [vmem:[%s4261_s2 + $0x8] sm:$0xff]  ;;  %s3066_s2 = smov 120  }
 0x1d7   :  { %v740_v62 = vrot.slane %v3545_v27, %v3573_v30  ;;  %v1102_v6 = vrot.slane %v3549_v5, %v3573_v30  ;;  %v1066_v7 = vrot.slane %v3514_v56, %v3573_v30  ;;  %v731_v39 = vrot.slane %v3518_v4, %v3573_v30 }
 0x1d8   :  { %v3561_v57 = vpop.permute.xlu1 %620  ;;  %v1088_v20 = vrot.slane %v3537_v37, %v3568_v48  ;;  %v1093_v19 = vrot.slane %v3522_v52, %v3573_v30  ;;  %v709_v24 = vsel %vm654_vm7, %v708_v14, %v704_v54  ;;  %v1097_v27 = vrot.slane %v3529_v36, %v3568_v48 }
 0x1d9   :  { %v744_v5 = vrot.slane %v3547_v44, %v3568_v48  ;;  %v1106_v56 = vrot.slane %v3551_v9, %v3568_v48  ;;  %v753_v4 = vrot.slane %v3539_v34, %v3568_v48  ;;  %v727_v37 = vsel %vm654_vm7, %v726_v53, %v722_v46 }
 0x1da   :  { %v1089_v52 = vsel %vm654_vm7, %v1088_v20, %v1084_v21  ;;  %v749_v31 = vrot.slane %v3535_v40, %v3573_v30  ;;  %v758_v44 = vrot.slane %v3561_v57, %v3573_v30  ;;  %v1071_v18 = vsel %vm654_vm7, %v1070_v45, %v1066_v7 }
 0x1db   :  { %v745_v55 = vsel %vm654_vm7, %v744_v5, %v740_v62  ;;  %v1107_v36 = vsel %vm654_vm7, %v1106_v56, %v1102_v6  ;;  %v736_v34 = vsel %vm654_vm7, %v735_v47, %v731_v39  ;;  %v1098_v0 = vsel %vm654_vm7, %v1097_v27, %v1093_v19  ;;  %v4369_v47 = vld [vmem:[#allocation42_spill] sm:$0xff]  ;;  %v4370_v21 = vld [vmem:[#allocation43_spill] sm:$0xff]  ;;  %v4371_v39 = vld [vmem:[#allocation44_spill] sm:$0xff] }
 0x1dc   :  { %v1111_v11 = vrot.slane %v3541_v32, %v3573_v30  ;;  %v805_v12 = vsel %vm791_vm8, %v736_v34, %v727_v37  ;;  %v1160_v35 = vsel %vm791_vm8, %v1098_v0, %v1089_v52  ;;  %v762_v57 = vrot.slane %v3565_v41, %v3568_v48 }
 0x1dd   :  { %v3570_v49 = vpop.permute.xlu1 %986  ;;  %v1115_v26 = vrot.slane %v3543_v23, %v3568_v48  ;;  %v754_v3 = vsel %vm654_vm7, %v753_v4, %v749_v31  ;;  %v806_v2 = vsel %vm793_vm9, %v745_v55, %v805_v12  ;;  %v1161_v32 = vsel %vm793_vm9, %v1107_v36, %v1160_v35  ;;  %v4373_v12 = vld [vmem:[#allocation34_spill] sm:$0xff]  ;;  %v4374_v35 = vld [vmem:[#allocation41_spill] sm:$0xff] }
 0x1de   :  { %v1120_v9 = vrot.slane %v3570_v49, %v3573_v30  ;;  %v1124_v49 = vrot.slane %v3585_v58, %v3568_v48  ;;  %v763_v14 = vsel %vm654_vm7, %v762_v57, %v758_v44  ;;  %v771_v23 = vrot.slane %v3555_v33, %v3568_v48 }
 0x1df   :  { %v1116_v58 = vsel %vm654_vm7, %v1115_v26, %v1111_v11  ;;  %v767_v46 = vrot.slane %v4369_v47, %v3573_v30  ;;  %v1129_v53 = vrot.slane %v4370_v21, %v3573_v30  ;;  %v807_v62 = vsel %vm795_vm10, %v754_v3, %v806_v2 }
 0x1e0   :  { %v1125_v45 = vsel %vm654_vm7, %v1124_v49, %v1120_v9  ;;  %v1162_v6 = vsel %vm795_vm10, %v1116_v58, %v1161_v32  ;;  %v1133_v20 = vrot.slane %v4371_v39, %v3568_v48  ;;  %v808_v19 = vsel %vm797_vm11, %v763_v14, %v807_v62 }
 0x1e1   :  { %v1163_v27 = vsel %vm797_vm11, %v1125_v45, %v1162_v6  ;;  %v802_v52 = vsel %vm801_vm13, %v709_v24, %v3670_v16  ;;  %v772_v31 = vsel %vm654_vm7, %v771_v23, %v767_v46  ;;  %vm4326_vm15 = vcmp.gt.f32.partialorder %v3798_v10, 0.5 }
 0x1e2   :  { %v3598_v8 = vpop.permute.xlu1 %638  ;;  %v1134_v55 = vsel %vm654_vm7, %v1133_v20, %v1129_v53  ;;  %v809_v44 = vsel %vm799_vm12, %v772_v31, %v808_v19 }
 0x1e3   :  { %4368 = vst [vmem:[#allocation45_spill] sm:$0xff] %v3598_v8  ;;  %v3613_v8 = vpop.permute.xlu0 %641  ;;  %v1164_v9 = vsel %vm799_vm12, %v1134_v55, %v1163_v27 }
 0x1e4   :  { %v789_v33 = vrot.slane %v3613_v8, %v3568_v48  ;;  %v1157_v8 = vsel %vm799_vm12, %v3654_v59, %v3663_v29 }
 0x1e5   :  { %v1158_v36 = vsel %vm801_vm13, %v1071_v18, %v1157_v8  ;;  %v1080_v18 = vsel %vm654_vm7, %v1079_v50, %v1075_v42 }
 0x1e6   :  { %v1159_v42 = vsel %vm803_vm14, %v1080_v18, %v1158_v36 }
 0x1e7   :  { %v3639_v63 = vpop.permute.xlu1 %1004  ;;  %v3647_v25 = vpop.permute.xlu0 %1007 }
 0x1e8   :  { %v1147_v4 = vrot.slane %v3639_v63, %v3573_v30  ;;  %v1151_v63 = vrot.slane %v3647_v25, %v3568_v48  ;;  %v718_v25 = vsel %vm654_vm7, %v717_v60, %v713_v17 }
 0x1e9   :  { %v804_v50 = vsel %vm803_vm14, %v718_v25, %v802_v52 }
 0x1ea   :  { %v4372_v5 = vld [vmem:[#allocation45_spill] sm:$0xff] }
 0x1eb   :  { %v636_v43 = vpop.permute.xlu0 %635  ;;  %v785_v56 = vrot.slane %v4372_v5, %v3573_v30 }
 0x1ec   :  { %v633_v15 = vpop.permute.xlu1 %632  ;;  %v780_v7 = vrot.slane %v636_v43, %v3568_v48 }
 0x1ed   :  { %v776_v41 = vrot.slane %v633_v15, %v3573_v30  ;;  %v790_v0 = vsel %vm654_vm7, %v789_v33, %v785_v56 }
 0x1ef   :  { %v1002_v28 = vpop.permute.xlu0 %1001  ;;  %v781_v43 = vsel %vm654_vm7, %v780_v7, %v776_v41 }
 0x1f0   :  { %v1142_v15 = vrot.slane %v1002_v28, %v3568_v48  ;;  %v810_v16 = vsel %vm801_vm13, %v781_v43, %v809_v44 }
 0x1f1   :  { %v999_v40 = vpop.permute.xlu1 %998  ;;  %v811_v17 = vsel %vm803_vm14, %v790_v0, %v810_v16 }
 0x1f2   :  { %v1138_v54 = vrot.slane %v999_v40, %v3573_v30  ;;  %v1152_v40 = vsel %vm654_vm7, %v1151_v63, %v1147_v4 }
 0x1f3   :  { %v905_v11 = vpop.permute.xlu0 %904 }
 0x1f4   :  { %v1143_v37 = vsel %vm654_vm7, %v1142_v15, %v1138_v54 }
 0x1f5   :  { %v1165_v24 = vsel %vm801_vm13, %v1143_v37, %v1164_v9 }
 0x1f6   :  { %v1166_v26 = vsel %vm803_vm14, %v1152_v40, %v1165_v24 }
 0x21b   :  { %v452_v34 = vpop.trf.xlu1 }
 0x21c   :  { %v512_v59 = vrot.slane %v452_v34, %v511_v22  ;;  %v910_v29 = vrot.slane %v452_v34, %v909_v13 }
 0x21e   :  { %v513_v51 = vadd.f32 %v512_v59, %v4373_v12  ;;  %v514_v57 = vadd.f32 %v512_v59, %v4374_v35  ;;  %v911_v49 = vadd.f32 %v910_v29, %v4375_v61  ;;  %v912_v60 = vadd.f32 %v910_v29, %v905_v11  ;;  %v4376_v11 = vld [vmem:[#allocation6_spill] sm:$0xff] }
 0x220   :  { %v814_v3 = vadd.f32 %v804_v50, %v513_v51  ;;  %v815_v2 = vadd.f32 %v811_v17, %v514_v57  ;;  %v1169_v32 = vadd.f32 %v1159_v42, %v911_v49  ;;  %v1170_v28 = vadd.f32 %v1166_v26, %v912_v60 }
 0x222   :  { %vm1172_vm2 = vcmp.ge.f32.partialorder %v1170_v28, 0.0  ;;  %v1174_v14 = vmul.f32 0.2, %v1170_v28  ;;  %vm816_vm3 = vcmp.ge.f32.partialorder %v814_v3, 0.0  ;;  %v818_v45 = vmul.f32 0.2, %v814_v3 }
 0x223   :  { %vm817_vm5 = vcmp.ge.f32.partialorder %v815_v2, 0.0  ;;  %v819_v41 = vmul.f32 0.2, %v815_v2  ;;  %v1173_v23 = vmul.f32 0.2, %v1169_v32  ;;  %vm1171_vm6 = vcmp.ge.f32.partialorder %v1169_v32, 0.0 }
 0x224   :  { %v1176_v54 = vsel %vm1172_vm2, %v1170_v28, %v1174_v14  ;;  %v820_v58 = vsel %vm816_vm3, %v814_v3, %v818_v45  ;;  %v4377_v28 = vmov 0.0   ;;  %vm896_vm2 = vcmask 64512  }
 0x225   :  { %v1178_v47 = vsel %vm4326_vm15, %v1176_v54, -1e+30  ;;  %v822_v46 = vsel %vm39_vm0, %v820_v58, -1e+30  ;;  %v821_v21 = vsel %vm817_vm5, %v815_v2, %v819_v41  ;;  %v1175_v7 = vsel %vm1171_vm6, %v1169_v32, %v1173_v23  ;;  %v2998_v23 = vld [vmem:[%s4265_s6] sm:$0xff]  }
 0x226   :  { %v1182_v53 = vsel %vm4327_vm4, %v1178_v47, -inf  ;;  %v825_v62 = vsel %vm4327_vm4, %v822_v46, -inf  ;;  %v823_v6 = vsel %vm4326_vm15, %v821_v21, -1e+30  ;;  %v1177_v39 = vsel %vm39_vm0, %v1175_v7, -1e+30 }
 0x227   :  { %1183 = vmax.xlane.f32.xlu1 %v1182_v53  ;;  %826 = vmax.xlane.f32.xlu0 %v825_v62  ;;  %v828_v15 = vsel %vm4327_vm4, %v823_v6, -inf  ;;  %v1179_v20 = vsel %vm4327_vm4, %v1177_v39, -inf  ;;  %vm1486_vm3 = vcmask 1043456  }
 0x22b   :  { %829 = vmax.xlane.f32.xlu0 %v828_v15  ;;  %v1387_v15 = vld [vmem:[%s4266_s7] sm:$0xf] }
 0x22f   :  { %1180 = vmax.xlane.f32.xlu0 %v1179_v20 }
 0x2b0   :  { %v827_v33 = vpop.xlane.xlu0 %826  ;;  %v1184_v27 = vpop.xlane.xlu1 %1183 }
 0x2b1   :  { %v831_v19 = vsub.f32 %v822_v46, %v827_v33  ;;  %v1186_v43 = vsub.f32 %v1178_v47, %v1184_v27 }
 0x2b3   :  { %v833_v5 = vmul.f32 1.442695, %v831_v19  ;;  %v1189_v31 = vmul.f32 1.442695, %v1186_v43 }
 0x2b4   :  { %v830_v56 = vpop.xlane.xlu0 %829 }
 0x2b5   :  { %v832_v4 = vsub.f32 %v823_v6, %v830_v56  ;;  %3000 = vpow2.f32 %v833_v5 }
 0x2b7   :  { %v835_v37 = vmul.f32 1.442695, %v832_v4 }
 0x2b8   :  { %v1181_v52 = vpop.xlane.xlu0 %1180 }
 0x2b9   :  { %3002 = vpow2.f32 %v835_v37  ;;  %v1185_v8 = vsub.f32 %v1177_v39, %v1181_v52  ;;  %v1488_v39 = vsel %vm1486_vm3, %v1387_v15, 0  ;;  %v4378_v52 = vld [vmem:[#allocation10_spill] sm:$0xff] }
 0x2bb   :  { %v1187_v55 = vmul.f32 1.442695, %v1185_v8  ;;  %v4379_v8 = vld [vmem:[#allocation9_spill] sm:$0xff] }
 0x2bd   :  { %3004 = vpow2.f32 %v1187_v55  ;;  %v4381_v55 = vld [vmem:[#allocation8_spill] sm:$0xff] }
 0x2be   :  { %3006 = vpow2.f32 %v1189_v31  ;;  %v4380_v31 = vpack.c.bf16 %v4378_v52, %v4379_v8 }
 0x2c2   :  { %v3001_v36 = vpop.eup %3000 }
 0x2c3   :  { %v837_v63 = vsel %vm39_vm0, %v3001_v36, 0.0  ;;  %v4382_v36 = vld [vmem:[#allocation7_spill] sm:$0xff] }
 0x2c4   :  { %v839_v44 = vsel %vm4327_vm4, %v837_v63, 0.0 }
 0x2c5   :  { %840 = vadd.xlane.f32.xlu0 %v839_v44  ;;  %v4384_v44 = vld [vmem:[#allocation14_spill] sm:$0xff] }
 0x2c6   :  { %v3003_v9 = vpop.eup %3002 }
 0x2c7   :  { %v838_v34 = vsel %vm4326_vm15, %v3003_v9, 0.0  ;;  %v4385_v9 = vld [vmem:[#allocation12_spill] sm:$0xff] }
 0x2c8   :  { %v842_v16 = vsel %vm4327_vm4, %v838_v34, 0.0 }
 0x2c9   :  { %843 = vadd.xlane.f32.xlu0 %v842_v16  ;;  %v4387_v16 = vld [vmem:[#allocation13_spill] sm:$0xff] }
 0x2ca   :  { %v3005_v24 = vpop.eup %3004 }
 0x2cb   :  { %v3007_v59 = vpop.eup %3006  ;;  %v1191_v29 = vsel %vm39_vm0, %v3005_v24, 0.0  ;;  %v4388_v24 = vld [vmem:[#allocation11_spill] sm:$0xff] }
 0x2cc   :  { %v1193_v25 = vsel %vm4327_vm4, %v1191_v29, 0.0  ;;  %v1192_v18 = vsel %vm4326_vm15, %v3007_v59, 0.0  ;;  %v4389_v59 = vpack.c.bf16 %v4387_v16, %v4388_v24  ;;  %v4415_v16 = vld [vmem:[#allocation40_spill] sm:$0xff] }
 0x2cd   :  { %1194 = vadd.xlane.f32.xlu0 %v1193_v25  ;;  %v1196_v0 = vsel %vm4327_vm4, %v1192_v18, 0.0  ;;  %v4391_v25 = vld [vmem:[#allocation16_spill] sm:$0xff]  ;;  %v1334_v24 = vmul.f32 0.01, %v4415_v16 }
 0x2d1   :  { %1197 = vadd.xlane.f32.xlu0 %v1196_v0  ;;  %v4393_v0 = vld [vmem:[#allocation24_spill] sm:$0xff] }
 0x2e7   :  { %1207 = vrot.lane.b32.xlu0 %v4376_v11, %s3066_s2  ;;  %v1321_v11 = vmul.f32 0.01, %v4393_v0 }
 0x34e   :  { %v841_v40 = vpop.xlane.xlu0 %840 }
 0x34f   :  { %v845_v12 = vmax.f32 %v841_v40, 1e-09  ;;  %v4394_v40 = vld [vmem:[#allocation26_spill] sm:$0xff] }
 0x351   :  { %3008 = vrcp.f32 %v845_v12  ;;  %v1322_v12 = vmul.f32 0.01, %v4394_v40 }
 0x352   :  { %v844_v51 = vpop.xlane.xlu0 %843 }
 0x353   :  { %v846_v35 = vmax.f32 %v844_v51, 1e-09  ;;  %v4395_v51 = vld [vmem:[#allocation17_spill] sm:$0xff] }
 0x355   :  { %3010 = vrcp.f32 %v846_v35  ;;  %v4396_v35 = vld [vmem:[#allocation15_spill] sm:$0xff] }
 0x356   :  { %v1195_v57 = vpop.xlane.xlu0 %1194 }
 0x357   :  { %v1199_v61 = vmax.f32 %v1195_v57, 1e-09  ;;  %v4397_v57 = vpack.c.bf16 %v4395_v51, %v4396_v35 }
 0x359   :  { %3012 = vrcp.f32 %v1199_v61  ;;  %v4398_v61 = vld [vmem:[#allocation22_spill] sm:$0xff] }
 0x35a   :  { %v1198_v49 = vpop.xlane.xlu0 %1197 }
 0x35b   :  { %v1200_v60 = vmax.f32 %v1198_v49, 1e-09  ;;  %v4399_v49 = vld [vmem:[#allocation20_spill] sm:$0xff] }
 0x35d   :  { %3014 = vrcp.f32 %v1200_v60  ;;  %v4400_v60 = vpack.c.bf16 %v4398_v61, %v4399_v49 }
 0x35e   :  { %v3009_v50 = vpop.eup %3008  ;;  %v1208_v2 = vpop.permute.xlu0 %1207 }
 0x35f   :  { %v849_v42 = vmul.f32 %v3009_v50, %v837_v63  ;;  %v4383_v63 = vpack.c.bf16 %v4381_v55, %v4382_v36  ;;  %v4413_v36 = vld [vmem:[#allocation33_spill] sm:$0xff] }
 0x362   :  { %v3011_v17 = vpop.eup %3010 }
 0x363   :  { %v850_v26 = vmul.f32 %v3011_v17, %v838_v34  ;;  %v4386_v34 = vpack.c.bf16 %v4384_v44, %v4385_v9  ;;  %v4414_v9 = vld [vmem:[#allocation38_spill] sm:$0xff] }
 0x365   :  { %v851_v3 = vpack.c.bf16 %v850_v26, %v849_v42  ;;  %v4401_v42 = vld [vmem:[#allocation23_spill] sm:$0xff] }
 0x366   :  { %v3013_v32 = vpop.eup %3012  ;;  %v1323_v26 = vmul.f32 0.01, %v4401_v42 }
 0x367   :  { %2760 = vmatmul.mubr.msk.bf16.vlgmr.msra.gmra.mxu0 %vm4327_vm4, %v851_v3  ;;  %v1203_v45 = vmul.f32 %v3013_v32, %v1191_v29  ;;  %v4390_v29 = vld [vmem:[#allocation18_spill] sm:$0xff]  ;;  %v4402_v3 = vld [vmem:[#allocation25_spill] sm:$0xff] }
 0x368   :  { %2764 = vmatpush3.bf16.msra.mxu0 %v1208_v2  ;;  %2765 = vmatprep.mubr.msk.bf16.mxu0 %vm4324_vm1, %v4377_v28  ;;  %v1324_v2 = vmul.f32 0.01, %v4402_v3 }
 0x369   :  { %2769 = vmatprep.subr.bf16.mxu0 %v4377_v28 }
 0x36a   :  { %v3015_v14 = vpop.eup %3014 }
 0x36b   :  { %v1204_v41 = vmul.f32 %v3015_v14, %v1192_v18  ;;  %v4392_v18 = vpack.c.bf16 %v4390_v29, %v4391_v25  ;;  %v4403_v14 = vld [vmem:[#allocation28_spill] sm:$0xff] }
 0x36d   :  { %v1205_v54 = vpack.c.bf16 %v1204_v41, %v1203_v45  ;;  %v1325_v45 = vmul.f32 0.01, %v4403_v14  ;;  %v4404_v41 = vld [vmem:[#allocation30_spill] sm:$0xff] }
 0x36f   :  { %2766 = vmatmul.mubr.msk.bf16.vlgmr.msra.gmra.mxu0 %vm4327_vm4, %v1205_v54  ;;  %v1326_v54 = vmul.f32 0.01, %v4404_v41 }
 0x370   :  { %2771 = vmatprep.mubr.msk.bf16.mxu0 %vm4324_vm1, %v4377_v28  ;;  %2770 = vmatpush3.bf16.msra.mxu0 %v2998_v23  ;;  %vm1292_vm1 = vcmp.ge.f32.partialorder %v4402_v3, 0.0  ;;  %v4406_v23 = vld [vmem:[#allocation19_spill] sm:$0xff] }
 0x371   :  { %2833 = vmatprep.subr.msk.bf16.mxu0 %vm1486_vm3, %v1387_v15  ;;  %vm1289_vm3 = vcmp.ge.f32.partialorder %v4393_v0, 0.0 }
 0x372   :  { %v1353_v50 = vsel %vm1289_vm3, %v4393_v0, %v1321_v11  ;;  %vm1293_vm3 = vcmp.ge.f32.partialorder %v4403_v14, 0.0  ;;  %v4416_v11 = vld [vmem:[#allocation37_spill] sm:$0xff] }
 0x427   :  { %v889_v58 = vpop.f32.mrf.mxu0 }
 0x428   :  { %897 = vst.msk [vmem:[#allocation2] sm:$0xff] %vm896_vm2, %v889_v58  ;;  %v4405_v58 = vld [vmem:[#allocation21_spill] sm:$0xff] }
 0x429   :  { %v2761_v47 = vpop.f32.mrf.mxu0 }
 0x42a   :  { %v4407_v47 = vpack.c.bf16 %v4405_v58, %v4406_v23 }
 0x42b   :  { %v892_v46 = vpop.f32.mrf.mxu0 }
 0x42c   :  { %898 = vst.msk [vmem:[#allocation2 + $0x8] sm:$0xff] %vm896_vm2, %v892_v46 }
 0x42d   :  { %v2762_v21 = vpop.f32.mrf.mxu0 }
 0x42e   :  { %v1356_v21 = vsel %vm1292_vm1, %v4402_v3, %v1324_v2  ;;  %v3068_v2 = vmov 1  }
 0x42f   :  { %v1247_v53 = vpop.f32.mrf.mxu0 }
 0x430   :  { %1256 = vrot.lane.b32.xlu1 %v1247_v53, %s3067_s11  ;;  %v1357_v53 = vsel %vm1293_vm3, %v4403_v14, %v1325_v45 }
 0x431   :  { %v2767_v62 = vpop.f32.mrf.mxu0 }
 0x433   :  { %v1250_v6 = vpop.f32.mrf.mxu0 }
 0x434   :  { %1258 = vrot.lane.b32.xlu0 %v1250_v6, %s3067_s11 }
 0x435   :  { %v2768_v7 = vpop.f32.mrf.mxu0 }
 0x436   :  { %v4408_v7 = vld [vmem:[#allocation27_spill] sm:$0xff] }
 0x437   :  { %v1327_v15 = vmul.f32 0.01, %v4408_v7  ;;  %vm1295_vm15 = vcmp.ge.f32.partialorder %v4408_v7, 0.0 }
 0x4a2   :  { %v1257_v20 = vpop.permute.xlu1 %1256 }
 0x4a3   :  { %1262 = vst.msk [vmem:[#allocation2] sm:$0xff] %vm654_vm7, %v1257_v20 }
 0x4a6   :  { %v1259_v33 = vpop.permute.xlu0 %1258 }
 0x4a7   :  { %1263 = vst.msk [vmem:[#allocation2 + $0x8] sm:$0xff] %vm654_vm7, %v1259_v33 }
 0x4aa   :  { %v1264_v19 = vld [vmem:[#allocation2] sm:$0xff] }
 0x4ab   :  { %v1268_v27 = vmul.f32 0.01, %v1264_v19  ;;  %vm1266_vm5 = vcmp.ge.f32.partialorder %v1264_v19, 0.0 }
 0x4ad   :  { %v1270_v4 = vsel %vm1266_vm5, %v1264_v19, %v1268_v27  ;;  %vm1290_vm5 = vcmp.ge.f32.partialorder %v4394_v40, 0.0  ;;  %v4410_v19 = vld [vmem:[#allocation32_spill] sm:$0xff] }
 0x4ae   :  { %v1265_v5 = vld [vmem:[#allocation2 + $0x8] sm:$0xff]  ;;  %v1354_v17 = vsel %vm1290_vm5, %v4394_v40, %v1322_v12  ;;  %vm1294_vm5 = vcmp.ge.f32.partialorder %v4404_v41, 0.0  ;;  %v1329_v27 = vmul.f32 0.01, %v4410_v19  ;;  %vm1297_vm1 = vcmp.ge.f32.partialorder %v4410_v19, 0.0  ;;  %v4417_v12 = vld [vmem:[#allocation39_spill] sm:$0xff] }
 0x4af   :  { %vm1267_vm6 = vcmp.ge.f32.partialorder %v1265_v5, 0.0  ;;  %v1269_v56 = vmul.f32 0.01, %v1265_v5  ;;  %v1377_v32 = vpack.c.bf16 %v1354_v17, %v1353_v50  ;;  %v1358_v62 = vsel %vm1294_vm5, %v4404_v41, %v1326_v54 }
 0x4b0   :  { %v1379_v33 = vpack.c.bf16 %v1358_v62, %v1357_v53  ;;  %vm1300_vm5 = vcmp.ge.f32.partialorder %v4413_v36, 0.0  ;;  %v1335_v40 = vmul.f32 0.01, %v4416_v11  ;;  %v1336_v51 = vmul.f32 0.01, %v4417_v12 }
 0x4b1   :  { %v1271_v43 = vsel %vm1267_vm6, %v1265_v5, %v1269_v56  ;;  %vm1291_vm6 = vcmp.ge.f32.partialorder %v4401_v42, 0.0  ;;  %v4411_v5 = vld [vmem:[#allocation36_spill] sm:$0xff] }
 0x4b2   :  { %v1272_v37 = vpack.c.bf16 %v1271_v43, %v1270_v4  ;;  %v1355_v46 = vsel %vm1291_vm6, %v4401_v42, %v1323_v26  ;;  %v1330_v56 = vmul.f32 0.01, %v4411_v5  ;;  %vm1298_vm6 = vcmp.ge.f32.partialorder %v4411_v5, 0.0 }
 0x4b3   :  { %v1378_v6 = vpack.c.bf16 %v1356_v21, %v1355_v46  ;;  %v1359_v4 = vsel %vm1295_vm15, %v4408_v7, %v1327_v15  ;;  %vm1301_vm15 = vcmp.ge.f32.partialorder %v4414_v9, 0.0 }
 0x4b4   :  { %2772 = vmatmul.mubr.msk.bf16.vlgmr.msra.gmra.mxu0 %vm4327_vm4, %v1272_v37  ;;  %v1361_v37 = vsel %vm1297_vm1, %v4410_v19, %v1329_v27  ;;  %v1362_v52 = vsel %vm1298_vm6, %v4411_v5, %v1330_v56  ;;  %vm1303_vm1 = vcmp.ge.f32.partialorder %v4416_v11, 0.0  ;;  %vm1304_vm6 = vcmp.ge.f32.partialorder %v4417_v12, 0.0 }
 0x4b5   :  { %2777 = vmatprep.mubr.msk.bf16.mxu0 %vm896_vm2, %v4380_v31  ;;  %2776 = vmatpush3.bf16.msra.mxu0 %v1488_v39  ;;  %v4409_v39 = vld [vmem:[#allocation29_spill] sm:$0xff]  ;;  %v4412_v31 = vld [vmem:[#allocation31_spill] sm:$0xff]  ;;  %v1381_v44 = vpack.c.bf16 %v1362_v52, %v1361_v37  ;;  %v1368_v61 = vsel %vm1304_vm6, %v4417_v12, %v1336_v51 }
 0x4b6   :  { %v1328_v20 = vmul.f32 0.01, %v4409_v39  ;;  %vm1296_vm4 = vcmp.ge.f32.partialorder %v4409_v39, 0.0  ;;  %v1331_v55 = vmul.f32 0.01, %v4412_v31  ;;  %vm1299_vm3 = vcmp.ge.f32.partialorder %v4412_v31, 0.0 }
 0x4b8   :  { %v1360_v43 = vsel %vm1296_vm4, %v4409_v39, %v1328_v20  ;;  %vm1302_vm4 = vcmp.ge.f32.partialorder %v4415_v16, 0.0 }
 0x4b9   :  { %v1380_v8 = vpack.c.bf16 %v1360_v43, %v1359_v4 }
 0x4bc   :  { %2778 = vmatmul.mubr.msk.bf16.vlgmr.msra.gmra.mxu0 %vm896_vm2, %v4383_v63  ;;  %v1332_v63 = vmul.f32 0.01, %v4413_v36 }
 0x4bd   :  { %2781 = vmatprep.mubr.msk.bf16.mxu0 %vm896_vm2, %v4386_v34  ;;  %v1333_v34 = vmul.f32 0.01, %v4414_v9 }
 0x4be   :  { %v1364_v29 = vsel %vm1300_vm5, %v4413_v36, %v1332_v63 }
 0x4bf   :  { %v1365_v25 = vsel %vm1301_vm15, %v4414_v9, %v1333_v34 }
 0x4c4   :  { %2782 = vmatmul.mubr.msk.bf16.gmra.mxu0 %vm896_vm2, %v4389_v59  ;;  %v1363_v59 = vsel %vm1299_vm3, %v4412_v31, %v1331_v55 }
 0x4c5   :  { %2785 = vmatprep.mubr.msk.bf16.mxu0 %vm896_vm2, %v4392_v18  ;;  %v1366_v18 = vsel %vm1302_vm4, %v4415_v16, %v1334_v24  ;;  %v1382_v0 = vpack.c.bf16 %v1364_v29, %v1363_v59 }
 0x4c6   :  { %v1383_v35 = vpack.c.bf16 %v1366_v18, %v1365_v25 }
 0x4cc   :  { %2786 = vmatmul.mubr.msk.bf16.gmra.mxu0 %vm896_vm2, %v4397_v57  ;;  %v1367_v57 = vsel %vm1303_vm1, %v4416_v11, %v1335_v40 }
 0x4cd   :  { %2789 = vmatprep.mubr.msk.bf16.mxu0 %vm896_vm2, %v4400_v60  ;;  %v1384_v49 = vpack.c.bf16 %v1368_v61, %v1367_v57 }
 0x4d4   :  { %2790 = vmatmul.mubr.msk.bf16.gmra.mxu0 %vm896_vm2, %v4407_v47 }
 0x4d5   :  { %2793 = vmatprep.mubr.msk.bf16.mxu0 %vm896_vm2, %v1377_v32  ;;  %v3069_v32 = vmov 0  }
 0x4dc   :  { %2794 = vmatmul.mubr.msk.bf16.gmra.mxu0 %vm896_vm2, %v1378_v6 }
 0x4dd   :  { %2797 = vmatprep.mubr.msk.bf16.mxu0 %vm896_vm2, %v1379_v33 }
 0x4e4   :  { %2798 = vmatmul.mubr.msk.bf16.gmra.mxu0 %vm896_vm2, %v1380_v8 }
 0x4e5   :  { %2801 = vmatprep.mubr.msk.bf16.mxu0 %vm896_vm2, %v1381_v44 }
 0x4ec   :  { %2802 = vmatmul.mubr.msk.bf16.gmra.mxu0 %vm896_vm2, %v1382_v0 }
 0x4ed   :  { %2805 = vmatprep.mubr.msk.bf16.mxu0 %vm896_vm2, %v1383_v35 }
 0x4f4   :  { %2806 = vmatmul.mubr.msk.bf16.gmra.mxu0 %vm896_vm2, %v1384_v49 }
 0x574   :  { %v3945_v60 = vpop.f32.mrf.mxu0 }
 0x575   :  { %1653 = vrot.lane.b32.xlu0 %v3945_v60, %s3063_s25 }
 0x576   :  { %v2773_v50 = vpop.f32.mrf.mxu0 }
 0x578   :  { %v3949_v17 = vpop.f32.mrf.mxu0 }
 0x579   :  { %v3953_v42 = vpack.c.bf16 %v3949_v17, %v3945_v60  ;;  %1725 = vperm.xlu0 %2915, %v3945_v60   ;;  %1729 = vperm.xlu1 %2916, %v3949_v17  }
 0x57a   :  { %v2774_v26 = vpop.f32.mrf.mxu0 }
 0x57b   :  { %2810 = vmatpush3.bf16.msra.mxu1 %v3953_v42 }
 0x57c   :  { %v2779_v3 = vpop.f32.mrf.mxu0  ;;  %2815 = vmatprep.subr.bf16.mxu1 %v4377_v28 }
 0x57d   :  { %2918 = vset.pattern.permute.xlu1 %v3068_v2  ;;  %1655 = vrot.lane.b32.xlu0 %v3949_v17, %s3063_s25 }
 0x57e   :  { %2130 = vperm.xlu1 %2918, %v2779_v3   ;;  %2917 = vset.pattern.permute.xlu0 %v3069_v32  ;;  %v1524_v14 = vpop.f32.mrf.mxu0 }
 0x580   :  { %v2780_v45 = vpop.f32.mrf.mxu0 }
 0x581   :  { %1777 = vperm.xlu0 %2917, %v2779_v3  }
 0x582   :  { %2124 = vperm.xlu1 %2918, %v1524_v14   ;;  %v1527_v41 = vpop.f32.mrf.mxu0 }
 0x584   :  { %v2783_v54 = vpop.f32.mrf.mxu0 }
 0x585   :  { %1771 = vperm.xlu0 %2917, %v1524_v14   ;;  %v4418_v14 = vmov 19  }
 0x586   :  { %2919 = vset.pattern.permute.xlu1 %v3069_v32  ;;  %v1540_v58 = vpop.f32.mrf.mxu0 }
 0x587   :  { %1780 = vperm.xlu1 %2919, %v2780_v45  }
 0x588   :  { %v2784_v23 = vpop.f32.mrf.mxu0 }
 0x589   :  { %2922 = vset.pattern.permute.xlu0 %v3068_v2 }
 0x58a   :  { %2127 = vperm.xlu0 %2922, %v1527_v41   ;;  %v1543_v47 = vpop.f32.mrf.mxu0 }
 0x58b   :  { %2920 = vset.pattern.permute.xlu1 %v3068_v2 }
 0x58c   :  { %2133 = vperm.xlu1 %2920, %v2780_v45   ;;  %v2787_v46 = vpop.f32.mrf.mxu0 }
 0x58e   :  { %2923 = vset.pattern.permute.xlu0 %v3069_v32  ;;  %v1556_v21 = vpop.f32.mrf.mxu0 }
 0x58f   :  { %1789 = vperm.xlu0 %2923, %v2783_v54  }
 0x590   :  { %2921 = vset.pattern.permute.xlu1 %v3069_v32  ;;  %v2788_v53 = vpop.f32.mrf.mxu0 }
 0x591   :  { %1774 = vperm.xlu1 %2921, %v1527_v41  }
 0x592   :  { %v1559_v62 = vpop.f32.mrf.mxu0 }
 0x593   :  { %2924 = vset.pattern.permute.xlu0 %v3068_v2 }
 0x594   :  { %2142 = vperm.xlu0 %2924, %v2783_v54   ;;  %v2791_v6 = vpop.f32.mrf.mxu0 }
 0x595   :  { %1792 = vperm.xlu1 %2921, %v2784_v23  }
 0x596   :  { %v1572_v7 = vpop.f32.mrf.mxu0 }
 0x598   :  { %2925 = vset.pattern.permute.xlu0 %v3069_v32  ;;  %v2792_v15 = vpop.f32.mrf.mxu0 }
 0x599   :  { %1783 = vperm.xlu0 %2925, %v1540_v58   ;;  %2927 = vset.pattern.permute.xlu1 %v3068_v2 }
 0x59a   :  { %2145 = vperm.xlu1 %2927, %v2784_v23   ;;  %v1575_v39 = vpop.f32.mrf.mxu0 }
 0x59c   :  { %v2795_v20 = vpop.f32.mrf.mxu0 }
 0x59d   :  { %2926 = vset.pattern.permute.xlu0 %v3068_v2 }
 0x59e   :  { %2136 = vperm.xlu0 %2926, %v1540_v58   ;;  %2928 = vset.pattern.permute.xlu1 %v3069_v32  ;;  %v1588_v33 = vpop.f32.mrf.mxu0 }
 0x59f   :  { %1786 = vperm.xlu1 %2928, %v1543_v47  }
 0x5a0   :  { %v2796_v19 = vpop.f32.mrf.mxu0 }
 0x5a2   :  { %2930 = vset.pattern.permute.xlu0 %v3069_v32  ;;  %v1591_v27 = vpop.f32.mrf.mxu0 }
 0x5a3   :  { %2929 = vset.pattern.permute.xlu1 %v3068_v2  ;;  %1801 = vperm.xlu0 %2930, %v2787_v46  }
 0x5a4   :  { %2139 = vperm.xlu1 %2929, %v1543_v47   ;;  %v2799_v5 = vpop.f32.mrf.mxu0 }
 0x5a6   :  { %v1604_v56 = vpop.f32.mrf.mxu0 }
 0x5a7   :  { %2931 = vset.pattern.permute.xlu0 %v3068_v2 }
 0x5a8   :  { %2934 = vset.pattern.permute.xlu1 %v3069_v32  ;;  %2154 = vperm.xlu0 %2931, %v2787_v46   ;;  %v2800_v4 = vpop.f32.mrf.mxu0 }
 0x5a9   :  { %1804 = vperm.xlu1 %2934, %v2788_v53  }
 0x5aa   :  { %v1607_v43 = vpop.f32.mrf.mxu0 }
 0x5ac   :  { %2932 = vset.pattern.permute.xlu0 %v3069_v32  ;;  %v2803_v37 = vpop.f32.mrf.mxu0 }
 0x5ad   :  { %1795 = vperm.xlu0 %2932, %v1556_v21   ;;  %2935 = vset.pattern.permute.xlu1 %v3068_v2 }
 0x5ae   :  { %2157 = vperm.xlu1 %2935, %v2788_v53   ;;  %v1620_v8 = vpop.f32.mrf.mxu0 }
 0x5b0   :  { %v2804_v36 = vpop.f32.mrf.mxu0 }
 0x5b1   :  { %2933 = vset.pattern.permute.xlu0 %v3068_v2 }
 0x5b2   :  { %2148 = vperm.xlu0 %2933, %v1556_v21   ;;  %2936 = vset.pattern.permute.xlu1 %v3069_v32  ;;  %v1623_v24 = vpop.f32.mrf.mxu0 }
 0x5b3   :  { %1798 = vperm.xlu1 %2936, %v1559_v62  }
 0x5b4   :  { %v2807_v11 = vpop.f32.mrf.mxu0 }
 0x5b6   :  { %2938 = vset.pattern.permute.xlu0 %v3069_v32  ;;  %v1636_v45 = vpop.f32.mrf.mxu0 }
 0x5b7   :  { %2937 = vset.pattern.permute.xlu1 %v3068_v2  ;;  %1813 = vperm.xlu0 %2938, %v2791_v6  }
 0x5b8   :  { %2151 = vperm.xlu1 %2937, %v1559_v62   ;;  %v2808_v21 = vpop.f32.mrf.mxu0 }
 0x5bb   :  { %2939 = vset.pattern.permute.xlu0 %v3068_v2 }
 0x5bc   :  { %2942 = vset.pattern.permute.xlu1 %v3069_v32  ;;  %2166 = vperm.xlu0 %2939, %v2791_v6  }
 0x5bd   :  { %1816 = vperm.xlu1 %2942, %v2792_v15  }
 0x5c0   :  { %2940 = vset.pattern.permute.xlu0 %v3069_v32 }
 0x5c1   :  { %1807 = vperm.xlu0 %2940, %v1572_v7   ;;  %2943 = vset.pattern.permute.xlu1 %v3068_v2 }
 0x5c2   :  { %2169 = vperm.xlu1 %2943, %v2792_v15  }
 0x5c5   :  { %2941 = vset.pattern.permute.xlu0 %v3068_v2 }
 0x5c6   :  { %2160 = vperm.xlu0 %2941, %v1572_v7   ;;  %2944 = vset.pattern.permute.xlu1 %v3069_v32 }
 0x5c7   :  { %1810 = vperm.xlu1 %2944, %v1575_v39  }
 0x5ca   :  { %2946 = vset.pattern.permute.xlu0 %v3069_v32 }
 0x5cb   :  { %2945 = vset.pattern.permute.xlu1 %v3068_v2  ;;  %1825 = vperm.xlu0 %2946, %v2795_v20  }
 0x5cc   :  { %2163 = vperm.xlu1 %2945, %v1575_v39  }
 0x5cf   :  { %2947 = vset.pattern.permute.xlu0 %v3068_v2 }
 0x5d0   :  { %2950 = vset.pattern.permute.xlu1 %v3069_v32  ;;  %2178 = vperm.xlu0 %2947, %v2795_v20  }
 0x5d1   :  { %1828 = vperm.xlu1 %2950, %v2796_v19  }
 0x5d4   :  { %2948 = vset.pattern.permute.xlu0 %v3069_v32 }
 0x5d5   :  { %1819 = vperm.xlu0 %2948, %v1588_v33   ;;  %2951 = vset.pattern.permute.xlu1 %v3068_v2 }
 0x5d6   :  { %2181 = vperm.xlu1 %2951, %v2796_v19  }
 0x5d9   :  { %2949 = vset.pattern.permute.xlu0 %v3068_v2 }
 0x5da   :  { %2172 = vperm.xlu0 %2949, %v1588_v33   ;;  %2952 = vset.pattern.permute.xlu1 %v3069_v32 }
 0x5db   :  { %1822 = vperm.xlu1 %2952, %v1591_v27  }
 0x5de   :  { %2954 = vset.pattern.permute.xlu0 %v3069_v32 }
 0x5df   :  { %2953 = vset.pattern.permute.xlu1 %v3068_v2  ;;  %1837 = vperm.xlu0 %2954, %v2799_v5  }
 0x5e0   :  { %2175 = vperm.xlu1 %2953, %v1591_v27   ;;  %v1639_v27 = vpop.f32.mrf.mxu0 }
 0x5e3   :  { %2955 = vset.pattern.permute.xlu0 %v3068_v2 }
 0x5e4   :  { %2958 = vset.pattern.permute.xlu1 %v3069_v32  ;;  %2190 = vperm.xlu0 %2955, %v2799_v5  }
 0x5e5   :  { %1840 = vperm.xlu1 %2958, %v2800_v4  }
 0x5e7   :  { %v4005_v52 = vpop.permute.xlu0 %1653 }
 0x5e8   :  { %2956 = vset.pattern.permute.xlu0 %v3069_v32 }
 0x5e9   :  { %1831 = vperm.xlu0 %2956, %v1604_v56   ;;  %2959 = vset.pattern.permute.xlu1 %v3068_v2 }
 0x5ea   :  { %2193 = vperm.xlu1 %2959, %v2800_v4  }
 0x5ed   :  { %2957 = vset.pattern.permute.xlu0 %v3068_v2 }
 0x5ee   :  { %2184 = vperm.xlu0 %2957, %v1604_v56   ;;  %2960 = vset.pattern.permute.xlu1 %v3069_v32 }
 0x5ef   :  { %1834 = vperm.xlu1 %2960, %v1607_v43  }
 0x5f2   :  { %2962 = vset.pattern.permute.xlu0 %v3069_v32 }
 0x5f3   :  { %2961 = vset.pattern.permute.xlu1 %v3068_v2  ;;  %1849 = vperm.xlu0 %2962, %v2803_v37  }
 0x5f4   :  { %v4009_v31 = vpop.permute.xlu0 %1725  ;;  %v4011_v55 = vpop.permute.xlu1 %1729  ;;  %2187 = vperm.xlu1 %2961, %v1607_v43  }
 0x5f7   :  { %2963 = vset.pattern.permute.xlu0 %v3068_v2 }
 0x5f8   :  { %v4014_v63 = vpop.permute.xlu0 %1655  ;;  %2966 = vset.pattern.permute.xlu1 %v3069_v32  ;;  %2202 = vperm.xlu0 %2963, %v2803_v37  }
 0x5f9   :  { %v2131_v44 = vpop.permute.xlu1 %2130  ;;  %1852 = vperm.xlu1 %2966, %v2804_v36  }
 0x5fa   :  { %v2231_v35 = vrot.slane %v2131_v44, %v3573_v30 }
 0x5fc   :  { %v1778_v9 = vpop.permute.xlu0 %1777  ;;  %2964 = vset.pattern.permute.xlu0 %v3069_v32 }
 0x5fd   :  { %v2125_v34 = vpop.permute.xlu1 %2124  ;;  %1843 = vperm.xlu0 %2964, %v1620_v8   ;;  %2967 = vset.pattern.permute.xlu1 %v3068_v2  ;;  %v1878_v29 = vrot.slane %v1778_v9, %v3573_v30 }
 0x5fe   :  { %2205 = vperm.xlu1 %2967, %v2804_v36   ;;  %v2222_v40 = vrot.slane %v2125_v34, %v3573_v30 }
 0x600   :  { %v1772_v16 = vpop.permute.xlu0 %1771 }
 0x601   :  { %2965 = vset.pattern.permute.xlu0 %v3068_v2  ;;  %v1869_v41 = vrot.slane %v1772_v16, %v3573_v30 }
 0x602   :  { %v1781_v59 = vpop.permute.xlu1 %1780  ;;  %2196 = vperm.xlu0 %2965, %v1620_v8   ;;  %2968 = vset.pattern.permute.xlu1 %v3069_v32 }
 0x603   :  { %v1882_v25 = vrot.slane %v1781_v59, %v3568_v48  ;;  %1846 = vperm.xlu1 %2968, %v1623_v24  }
 0x605   :  { %v1883_v18 = vsel %vm654_vm7, %v1882_v25, %v1878_v29  ;;  %v2128_v0 = vpop.permute.xlu0 %2127 }
 0x606   :  { %v2226_v12 = vrot.slane %v2128_v0, %v3568_v48  ;;  %2970 = vset.pattern.permute.xlu0 %v3069_v32 }
 0x607   :  { %v2134_v51 = vpop.permute.xlu1 %2133  ;;  %2969 = vset.pattern.permute.xlu1 %v3068_v2  ;;  %1861 = vperm.xlu0 %2970, %v2807_v11  }
 0x608   :  { %v2227_v57 = vsel %vm654_vm7, %v2226_v12, %v2222_v40  ;;  %v2235_v61 = vrot.slane %v2134_v51, %v3568_v48  ;;  %2199 = vperm.xlu1 %2969, %v1623_v24  }
 0x60a   :  { %v2236_v49 = vsel %vm654_vm7, %v2235_v61, %v2231_v35  ;;  %v1790_v50 = vpop.permute.xlu0 %1789 }
 0x60b   :  { %v2363_v26 = vsel %vm791_vm8, %v2236_v49, %v2227_v57  ;;  %2971 = vset.pattern.permute.xlu0 %v3068_v2  ;;  %v1896_v53 = vrot.slane %v1790_v50, %v3573_v30 }
 0x60c   :  { %v1775_v3 = vpop.permute.xlu1 %1774  ;;  %2975 = vset.pattern.permute.xlu1 %v4418_v14  ;;  %2214 = vperm.xlu0 %2971, %v2807_v11  }
 0x60d   :  { %v1873_v54 = vrot.slane %v1775_v3, %v3568_v48  ;;  %2114 = vperm.xlu1 %2975, %v3949_v17  }
 0x60f   :  { %v1874_v58 = vsel %vm654_vm7, %v1873_v54, %v1869_v41  ;;  %v2143_v23 = vpop.permute.xlu0 %2142 }
 0x610   :  { %v2010_v47 = vsel %vm791_vm8, %v1883_v18, %v1874_v58  ;;  %v1793_v46 = vpop.permute.xlu1 %1792  ;;  %2972 = vset.pattern.permute.xlu0 %v3069_v32  ;;  %v2249_v15 = vrot.slane %v2143_v23, %v3573_v30 }
 0x611   :  { %v1900_v62 = vrot.slane %v1793_v46, %v3568_v48  ;;  %2976 = vset.pattern.permute.xlu1 %v3069_v32  ;;  %1855 = vperm.xlu0 %2972, %v1636_v45  }
 0x612   :  { %1864 = vperm.xlu1 %2976, %v2808_v21  }
 0x613   :  { %v1901_v6 = vsel %vm654_vm7, %v1900_v62, %v1896_v53 }
 0x614   :  { %v1784_v17 = vpop.permute.xlu0 %1783 }
 0x615   :  { %v2146_v7 = vpop.permute.xlu1 %2145  ;;  %2973 = vset.pattern.permute.xlu0 %v3068_v2  ;;  %v1887_v5 = vrot.slane %v1784_v17, %v3573_v30 }
 0x616   :  { %v2253_v39 = vrot.slane %v2146_v7, %v3568_v48  ;;  %2208 = vperm.xlu0 %2973, %v1636_v45   ;;  %2977 = vset.pattern.permute.xlu1 %v3068_v2 }
 0x617   :  { %2217 = vperm.xlu1 %2977, %v2808_v21  }
 0x618   :  { %v2254_v20 = vsel %vm654_vm7, %v2253_v39, %v2249_v15 }
 0x619   :  { %v2137_v33 = vpop.permute.xlu0 %2136 }
 0x61a   :  { %v1787_v19 = vpop.permute.xlu1 %1786  ;;  %2974 = vset.pattern.permute.xlu0 %v4418_v14  ;;  %v2240_v44 = vrot.slane %v2137_v33, %v3573_v30 }
 0x61b   :  { %v1891_v56 = vrot.slane %v1787_v19, %v3568_v48  ;;  %2110 = vperm.xlu0 %2974, %v3945_v60   ;;  %2978 = vset.pattern.permute.xlu1 %v3069_v32 }
 0x61c   :  { %1858 = vperm.xlu1 %2978, %v1639_v27  }
 0x61d   :  { %v1892_v4 = vsel %vm654_vm7, %v1891_v56, %v1887_v5 }
 0x61e   :  { %v2011_v43 = vsel %vm793_vm9, %v1892_v4, %v2010_v47  ;;  %v1802_v37 = vpop.permute.xlu0 %1801 }
 0x61f   :  { %v2140_v8 = vpop.permute.xlu1 %2139  ;;  %v2012_v36 = vsel %vm795_vm10, %v1901_v6, %v2011_v43  ;;  %2980 = vset.pattern.permute.xlu0 %v3068_v2  ;;  %v1914_v59 = vrot.slane %v1802_v37, %v3573_v30 }
 0x620   :  { %v2244_v9 = vrot.slane %v2140_v8, %v3568_v48  ;;  %2979 = vset.pattern.permute.xlu1 %v3068_v2 }
 0x621   :  { %2211 = vperm.xlu1 %2979, %v1639_v27  }
 0x622   :  { %v2245_v60 = vsel %vm654_vm7, %v2244_v9, %v2240_v44 }
 0x623   :  { %v2364_v32 = vsel %vm793_vm9, %v2245_v60, %v2363_v26  ;;  %v2155_v34 = vpop.permute.xlu0 %2154 }
 0x624   :  { %v1805_v16 = vpop.permute.xlu1 %1804  ;;  %v2365_v24 = vsel %vm795_vm10, %v2254_v20, %v2364_v32  ;;  %v2267_v11 = vrot.slane %v2155_v34, %v3573_v30 }
 0x625   :  { %v1918_v29 = vrot.slane %v1805_v16, %v3568_v48 }
 0x627   :  { %v1919_v25 = vsel %vm654_vm7, %v1918_v29, %v1914_v59 }
 0x628   :  { %v1796_v18 = vpop.permute.xlu0 %1795 }
 0x629   :  { %v2158_v0 = vpop.permute.xlu1 %2157  ;;  %v1905_v35 = vrot.slane %v1796_v18, %v3573_v30 }
 0x62a   :  { %v2271_v2 = vrot.slane %v2158_v0, %v3568_v48 }
 0x62c   :  { %v2272_v40 = vsel %vm654_vm7, %v2271_v2, %v2267_v11 }
 0x62d   :  { %v2149_v12 = vpop.permute.xlu0 %2148 }
 0x62e   :  { %v1799_v51 = vpop.permute.xlu1 %1798  ;;  %v2258_v14 = vrot.slane %v2149_v12, %v3573_v30 }
 0x62f   :  { %v1909_v57 = vrot.slane %v1799_v51, %v3568_v48 }
 0x631   :  { %v1910_v61 = vsel %vm654_vm7, %v1909_v57, %v1905_v35 }
 0x632   :  { %v2013_v49 = vsel %vm797_vm11, %v1910_v61, %v2012_v36  ;;  %v1814_v50 = vpop.permute.xlu0 %1813 }
 0x633   :  { %v2152_v26 = vpop.permute.xlu1 %2151  ;;  %v2014_v3 = vsel %vm799_vm12, %v1919_v25, %v2013_v49  ;;  %v1932_v47 = vrot.slane %v1814_v50, %v3573_v30 }
 0x634   :  { %v2262_v45 = vrot.slane %v2152_v26, %v3568_v48 }
 0x636   :  { %v2263_v41 = vsel %vm654_vm7, %v2262_v45, %v2258_v14 }
 0x637   :  { %v2366_v54 = vsel %vm797_vm11, %v2263_v41, %v2365_v24  ;;  %v2167_v46 = vpop.permute.xlu0 %2166 }
 0x638   :  { %v1817_v58 = vpop.permute.xlu1 %1816  ;;  %v2367_v23 = vsel %vm799_vm12, %v2272_v40, %v2366_v54  ;;  %v2285_v6 = vrot.slane %v2167_v46, %v3573_v30 }
 0x639   :  { %v1936_v21 = vrot.slane %v1817_v58, %v3568_v48 }
 0x63b   :  { %v1937_v53 = vsel %vm654_vm7, %v1936_v21, %v1932_v47 }
 0x63c   :  { %v1808_v7 = vpop.permute.xlu0 %1807 }
 0x63d   :  { %v2170_v62 = vpop.permute.xlu1 %2169  ;;  %v1923_v20 = vrot.slane %v1808_v7, %v3573_v30 }
 0x63e   :  { %v2289_v17 = vrot.slane %v2170_v62, %v3568_v48 }
 0x640   :  { %v2290_v15 = vsel %vm654_vm7, %v2289_v17, %v2285_v6 }
 0x641   :  { %v2161_v19 = vpop.permute.xlu0 %2160 }
 0x642   :  { %v1811_v39 = vpop.permute.xlu1 %1810  ;;  %v2276_v43 = vrot.slane %v2161_v19, %v3573_v30 }
 0x643   :  { %v1927_v33 = vrot.slane %v1811_v39, %v3568_v48 }
 0x645   :  { %v1928_v27 = vsel %vm654_vm7, %v1927_v33, %v1923_v20 }
 0x646   :  { %v2015_v5 = vsel %vm801_vm13, %v1928_v27, %v2014_v3  ;;  %v1826_v32 = vpop.permute.xlu0 %1825 }
 0x647   :  { %v2164_v56 = vpop.permute.xlu1 %2163  ;;  %v4092_v4 = vsel %vm803_vm14, %v1937_v53, %v2015_v5  ;;  %v1950_v17 = vrot.slane %v1826_v32, %v3573_v30 }
 0x648   :  { %v2280_v37 = vrot.slane %v2164_v56, %v3568_v48 }
 0x64a   :  { %v2281_v8 = vsel %vm654_vm7, %v2280_v37, %v2276_v43  ;;  %1659 = vxpose.xlu1.b32.start [1/2] (short) (narrow) %v4005_v52, 8 }
 0x64b   :  { %v2368_v36 = vsel %vm801_vm13, %v2281_v8, %v2367_v23  ;;  %v2179_v16 = vpop.permute.xlu0 %2178 }
 0x64c   :  { %v4100_v44 = vsel %vm803_vm14, %v2290_v15, %v2368_v36  ;;  %v1829_v9 = vpop.permute.xlu1 %1828  ;;  %v2303_v5 = vrot.slane %v2179_v16, %v3573_v30 }
 0x64d   :  { %v1954_v47 = vrot.slane %v1829_v9, %v3568_v48 }
 0x64e   :  { %1660 = vxpose.xlu1.b32.end [2/2] (short) (narrow) %v4014_v63, 8 }
 0x64f   :  { %v1955_v56 = vsel %vm654_vm7, %v1954_v47, %v1950_v17 }
 0x650   :  { %v1820_v59 = vpop.permute.xlu0 %1819 }
 0x651   :  { %v2182_v60 = vpop.permute.xlu1 %2181  ;;  %v1941_v46 = vrot.slane %v1820_v59, %v3573_v30 }
 0x652   :  { %v2307_v7 = vrot.slane %v2182_v60, %v3568_v48 }
 0x654   :  { %v2308_v32 = vsel %vm654_vm7, %v2307_v7, %v2303_v5 }
 0x655   :  { %v2173_v25 = vpop.permute.xlu0 %2172 }
 0x656   :  { %v1823_v34 = vpop.permute.xlu1 %1822  ;;  %v2294_v15 = vrot.slane %v2173_v25, %v3573_v30 }
 0x657   :  { %v1945_v58 = vrot.slane %v1823_v34, %v3568_v48 }
 0x659   :  { %v1946_v39 = vsel %vm654_vm7, %v1945_v58, %v1941_v46 }
 0x65a   :  { %v1838_v0 = vpop.permute.xlu0 %1837  ;;  %v2017_v8 = vsel %vm791_vm8, %v1955_v56, %v1946_v39 }
 0x65b   :  { %v2176_v24 = vpop.permute.xlu1 %2175  ;;  %v1968_v34 = vrot.slane %v1838_v0, %v3573_v30 }
 0x65c   :  { %v2298_v21 = vrot.slane %v2176_v24, %v3568_v48 }
 0x65e   :  { %v2299_v43 = vsel %vm654_vm7, %v2298_v21, %v2294_v15 }
 0x65f   :  { %v2191_v11 = vpop.permute.xlu0 %2190  ;;  %v2370_v59 = vsel %vm791_vm8, %v2308_v32, %v2299_v43 }
 0x660   :  { %v1841_v29 = vpop.permute.xlu1 %1840 }
 0x661   :  { %v1972_v37 = vrot.slane %v1841_v29, %v3568_v48 }
 0x664   :  { %v1832_v40 = vpop.permute.xlu0 %1831 }
 0x665   :  { %v4103_v18 = vpop.permute.xlu1 %2193  ;;  %v1959_v53 = vrot.slane %v1832_v40, %v3573_v30  ;;  %v2321_v40 = vrot.slane %v2191_v11, %v3573_v30 }
 0x666   :  { %v2325_v16 = vrot.slane %v4103_v18, %v3568_v48 }
 0x669   :  { %v2185_v51 = vpop.permute.xlu0 %2184 }
 0x66a   :  { %v1835_v52 = vpop.permute.xlu1 %1834  ;;  %v2312_v20 = vrot.slane %v2185_v51, %v3573_v30  ;;  %v1973_v51 = vsel %vm654_vm7, %v1972_v37, %v1968_v34 }
 0x66b   :  { %v1963_v23 = vrot.slane %v1835_v52, %v3568_v48 }
 0x66d   :  { %v1964_v33 = vsel %vm654_vm7, %v1963_v23, %v1959_v53  ;;  %v2326_v23 = vsel %vm654_vm7, %v2325_v16, %v2321_v40 }
 0x66e   :  { %v1850_v35 = vpop.permute.xlu0 %1849  ;;  %v2018_v24 = vsel %vm793_vm9, %v1964_v33, %v2017_v8 }
 0x66f   :  { %v2188_v2 = vpop.permute.xlu1 %2187  ;;  %v1986_v11 = vrot.slane %v1850_v35, %v3573_v30 }
 0x670   :  { %v2316_v62 = vrot.slane %v2188_v2, %v3568_v48 }
 0x672   :  { %v2317_v36 = vsel %vm654_vm7, %v2316_v62, %v2312_v20 }
 0x673   :  { %v4109_v61 = vpop.permute.xlu0 %2202  ;;  %v2371_v0 = vsel %vm793_vm9, %v2317_v36, %v2370_v59 }
 0x674   :  { %v4105_v12 = vpop.permute.xlu1 %1852 }
 0x675   :  { %v1990_v18 = vrot.slane %v4105_v12, %v3568_v48  ;;  %v2339_v12 = vrot.slane %v4109_v61, %v3573_v30 }
 0x677   :  { %v1991_v53 = vsel %vm654_vm7, %v1990_v18, %v1986_v11 }
 0x678   :  { %v1844_v50 = vpop.permute.xlu0 %1843 }
 0x679   :  { %v4107_v63 = vpop.permute.xlu1 %2205  ;;  %v1977_v9 = vrot.slane %v1844_v50, %v3573_v30 }
 0x67d   :  { %v2197_v3 = vpop.permute.xlu0 %2196 }
 0x67e   :  { %v1847_v57 = vpop.permute.xlu1 %1846  ;;  %v2330_v29 = vrot.slane %v2197_v3, %v3573_v30 }
 0x67f   :  { %v1981_v19 = vrot.slane %v1847_v57, %v3568_v48  ;;  %v2343_v57 = vrot.slane %v4107_v63, %v3568_v48  ;;  %v2372_v63 = vsel %vm795_vm10, %v2326_v23, %v2371_v0 }
 0x681   :  { %v1982_v25 = vsel %vm654_vm7, %v1981_v19, %v1977_v9  ;;  %v2344_v17 = vsel %vm654_vm7, %v2343_v57, %v2339_v12 }
 0x682   :  { %v4115_v45 = vpop.permute.xlu0 %1861 }
 0x683   :  { %v2200_v49 = vpop.permute.xlu1 %2199  ;;  %v2004_v7 = vrot.slane %v4115_v45, %v3573_v30 }
 0x684   :  { %v2334_v60 = vrot.slane %v2200_v49, %v3568_v48  ;;  %v2019_v49 = vsel %vm795_vm10, %v1973_v51, %v2018_v24 }
 0x685   :  { %v2020_v47 = vsel %vm797_vm11, %v1982_v25, %v2019_v49 }
 0x686   :  { %v2335_v50 = vsel %vm654_vm7, %v2334_v60, %v2330_v29  ;;  %v2021_v61 = vsel %vm799_vm12, %v1991_v53, %v2020_v47 }
 0x687   :  { %v4119_v54 = vpop.permute.xlu0 %2214  ;;  %v2373_v62 = vsel %vm797_vm11, %v2335_v50, %v2372_v63  ;;  %vm4419_vm11 = vcmask 130048  }
 0x688   :  { %v4111_v26 = vpop.permute.xlu1 %2114  ;;  %v2374_v5 = vsel %vm799_vm12, %v2344_v17, %v2373_v62  ;;  %v2357_v8 = vrot.slane %v4119_v54, %v3573_v30  ;;  %vm4420_vm12 = vcmp.gt.f32.partialorder %v3798_v10, 0.5  ;;  %vm4421_vm3 = vmmov %vm4419_vm11 }
 0x689   :  { %vm4423_vm5 = vmmov %vm4420_vm12 }
 0x68a   :  { %vm4424_vm15 = vmmov %vm4421_vm3 }
 0x68b   :  { %vm4425_vm4 = vmmov %vm4421_vm3 }
 0x68c   :  { %v1856_v27 = vpop.permute.xlu0 %1855  ;;  %vm4426_vm1 = vmmov %vm4423_vm5 }
 0x68d   :  { %v4113_v14 = vpop.permute.xlu1 %1864  ;;  %v1995_v3 = vrot.slane %v1856_v27, %v3573_v30  ;;  %vm4427_vm6 = vmmov %vm4421_vm3 }
 0x691   :  { %v2209_v58 = vpop.permute.xlu0 %2208 }
 0x692   :  { %v4117_v41 = vpop.permute.xlu1 %2217  ;;  %v2348_v35 = vrot.slane %v2209_v58, %v3573_v30 }
 0x693   :  { %v2361_v19 = vrot.slane %v4117_v41, %v3568_v48 }
 0x695   :  { %v2362_v9 = vsel %vm654_vm7, %v2361_v19, %v2357_v8 }
 0x696   :  { %v2111_v27 = vpop.permute.xlu0 %2110 }
 0x697   :  { %v1859_v6 = vpop.permute.xlu1 %1858 }
 0x698   :  { %v1999_v52 = vrot.slane %v1859_v6, %v3568_v48  ;;  %v2008_v6 = vrot.slane %v4113_v14, %v3568_v48 }
 0x69a   :  { %v2000_v21 = vsel %vm654_vm7, %v1999_v52, %v1995_v3  ;;  %v2009_v45 = vsel %vm654_vm7, %v2008_v6, %v2004_v7 }
 0x69b   :  { %v2022_v39 = vsel %vm801_vm13, %v2000_v21, %v2021_v61 }
 0x69c   :  { %v2212_v2 = vpop.permute.xlu1 %2211  ;;  %v2023_v38 = vsel %vm803_vm14, %v2009_v45, %v2022_v39 }
 0x69d   :  { %v2352_v46 = vrot.slane %v2212_v2, %v3568_v48 }
 0x69f   :  { %v2353_v20 = vsel %vm654_vm7, %v2352_v46, %v2348_v35 }
 0x6c6   :  { %v1675_v15 = vpop.trf.xlu1 }
 0x6c7   :  { %v1735_v33 = vrot.slane %v1675_v15, %v511_v22  ;;  %v2120_v14 = vrot.slane %v1675_v15, %v909_v13  ;;  %v2375_v22 = vsel %vm801_vm13, %v2353_v20, %v2374_v5 }
 0x6c8   :  { %v2376_v60 = vsel %vm803_vm14, %v2362_v9, %v2375_v22  ;;  %vm4422_vm14 = vmmov %vm4421_vm3 }
 0x6c9   :  { %v1736_v56 = vadd.f32 %v1735_v33, %v4009_v31  ;;  %v1737_v43 = vadd.f32 %v1735_v33, %v4011_v55  ;;  %v2121_v37 = vadd.f32 %v2120_v14, %v2111_v27  ;;  %v2122_v41 = vadd.f32 %v2120_v14, %v4111_v26 }
 0x6cb   :  { %v2026_v13 = vadd.f32 %v4092_v4, %v1736_v56  ;;  %v2027_v48 = vadd.f32 %v2023_v38, %v1737_v43  ;;  %v2379_v36 = vadd.f32 %v4100_v44, %v2121_v37  ;;  %v2380_v30 = vadd.f32 %v2376_v60, %v2122_v41 }
 0x6cd   :  { %vm2028_vm8 = vcmp.ge.f32.partialorder %v2026_v13, 0.0  ;;  %v2030_v31 = vmul.f32 0.2, %v2026_v13  ;;  %vm2029_vm9 = vcmp.ge.f32.partialorder %v2027_v48, 0.0  ;;  %v2031_v55 = vmul.f32 0.2, %v2027_v48 }
 0x6ce   :  { %v2383_v34 = vmul.f32 0.2, %v2379_v36  ;;  %vm2381_vm10 = vcmp.ge.f32.partialorder %v2379_v36, 0.0  ;;  %v2384_v24 = vmul.f32 0.2, %v2380_v30  ;;  %vm2382_vm13 = vcmp.ge.f32.partialorder %v2380_v30, 0.0 }
 0x6cf   :  { %v2032_v54 = vsel %vm2028_vm8, %v2026_v13, %v2030_v31  ;;  %v2033_v32 = vsel %vm2029_vm9, %v2027_v48, %v2031_v55  ;;  %vm4428_vm8 = vmmov %vm4421_vm3 }
 0x6d0   :  { %v2034_v4 = vsel %vm39_vm0, %v2032_v54, -1e+30  ;;  %v2035_v44 = vsel %vm4420_vm12, %v2033_v32, -1e+30  ;;  %v2385_v16 = vsel %vm2381_vm10, %v2379_v36, %v2383_v34  ;;  %v2386_v25 = vsel %vm2382_vm13, %v2380_v30, %v2384_v24  ;;  %vm4429_vm9 = vmmov %vm4426_vm1  ;;  %v2477_v24 = vld [vmem:[%s4262_s3] sm:$0x1] }
 0x6d1   :  { %v2036_v26 = vsel %vm4419_vm11, %v2034_v4, -inf  ;;  %v2039_v59 = vsel %vm4421_vm3, %v2035_v44, -inf  ;;  %v2387_v29 = vsel %vm39_vm0, %v2385_v16, -1e+30  ;;  %v2388_v2 = vsel %vm4423_vm5, %v2386_v25, -1e+30  ;;  %vm4430_vm10 = vmmov %vm4421_vm3 }
 0x6d2   :  { %2037 = vmax.xlane.f32.xlu0 %v2036_v26  ;;  %v2389_v52 = vsel %vm4422_vm14, %v2387_v29, -inf  ;;  %v2392_v40 = vsel %vm4424_vm15, %v2388_v2, -inf  ;;  %vm4432_vm11 = vmmov 0   ;;  %vm2580_vm13 = vcmask 17408  }
 0x6d6   :  { %2040 = vmax.xlane.f32.xlu0 %v2039_v59  ;;  %v2999_v59 = vld [vmem:[%s4267_s8] sm:$0xff]   ;;  %s3070_s8 = smov [#allocation3]  }
 0x6da   :  { %2390 = vmax.xlane.f32.xlu0 %v2389_v52 }
 0x6de   :  { %2393 = vmax.xlane.f32.xlu0 %v2392_v40 }
 0x75b   :  { %v2038_v51 = vpop.xlane.xlu0 %2037 }
 0x75c   :  { %v2042_v0 = vsub.f32 %v2034_v4, %v2038_v51  ;;  %v2664_v51 = vld [vmem:[%s4268_s9] ss:$0 sm:$0xff]  ;;  %s2599_s9 = sshll.u32 %s3070_s8, 4  ;;  %s2600_s9 = int_to_ptr.vmem [resolvable:$true] %s2599_s9 }
 0x75d   :  { %s3036_s17 = scalar_lea.vmem %s2600_s9, 32  ;;  %p3041_p1 = scmp.lt.s32.totalorder %s2600_s9, %s2600_s9 }
 0x75e   :  { %v2044_v18 = vmul.f32 1.442695, %v2042_v0  ;;  %p3037_p0 = scmp.ne.s32.totalorder %s2600_s9, %s3036_s17  ;;  %p3042_p2 = scmp.lt.s32.totalorder %s3036_s17, %s3036_s17 }
 0x75f   :  { %v2041_v57 = vpop.xlane.xlu0 %2040 }
 0x760   :  { %3016 = vpow2.f32 %v2044_v18  ;;  %v2043_v49 = vsub.f32 %v2035_v44, %v2041_v57  ;;  %p3043_p3 = por %p3042_p2, %p3041_p1 }
 0x762   :  { %v2046_v50 = vmul.f32 1.442695, %v2043_v49  ;;  %p3044_p4 = pnand %p3043_p3, %p3037_p0 }
 0x763   :  { %v2391_v3 = vpop.xlane.xlu0 %2390 }
 0x764   :  { %3018 = vpow2.f32 %v2046_v50  ;;  %v2395_v58 = vsub.f32 %v2387_v29, %v2391_v3 }
 0x766   :  { %v2397_v23 = vmul.f32 1.442695, %v2395_v58 }
 0x767   :  { %v2394_v11 = vpop.xlane.xlu0 %2393 }
 0x768   :  { %3020 = vpow2.f32 %v2397_v23  ;;  %v2396_v47 = vsub.f32 %v2388_v2, %v2394_v11 }
 0x76a   :  { %v2399_v46 = vmul.f32 1.442695, %v2396_v47 }
 0x76c   :  { %3022 = vpow2.f32 %v2399_v46 }
 0x76d   :  { %v3017_v12 = vpop.eup %3016 }
 0x76e   :  { %v2048_v63 = vsel %vm39_vm0, %v3017_v12, 0.0 }
 0x76f   :  { %v2050_v21 = vsel %vm4425_vm4, %v2048_v63, 0.0 }
 0x770   :  { %2051 = vadd.xlane.f32.xlu1 %v2050_v21 }
 0x771   :  { %v3019_v53 = vpop.eup %3018 }
 0x772   :  { %v2049_v62 = vsel %vm4426_vm1, %v3019_v53, 0.0 }
 0x773   :  { %v2053_v6 = vsel %vm4427_vm6, %v2049_v62, 0.0 }
 0x774   :  { %2054 = vadd.xlane.f32.xlu0 %v2053_v6 }
 0x775   :  { %v3021_v35 = vpop.eup %3020 }
 0x776   :  { %v2401_v17 = vsel %vm39_vm0, %v3021_v35, 0.0  ;;  %vm4431_vm0 = vmmov %vm4421_vm3 }
 0x777   :  { %v2403_v7 = vsel %vm4428_vm8, %v2401_v17, 0.0  ;;  %vm4433_vm12 = vmmov %vm4431_vm0 }
 0x778   :  { %2404 = vadd.xlane.f32.xlu0 %v2403_v7 }
 0x779   :  { %v3023_v61 = vpop.eup %3022 }
 0x77a   :  { %v2402_v15 = vsel %vm4429_vm9, %v3023_v61, 0.0 }
 0x77b   :  { %v2406_v39 = vsel %vm4430_vm10, %v2402_v15, 0.0 }
 0x77c   :  { %2407 = vadd.xlane.f32.xlu0 %v2406_v39 }
 0x792   :  { %2417 = vrot.lane.b32.xlu0 %v3953_v42, %s3066_s2 }
 0x7f9   :  { %v2052_v20 = vpop.xlane.xlu1 %2051 }
 0x7fa   :  { %v2056_v33 = vmax.f32 %v2052_v20, 1e-09 }
 0x7fc   :  { %3024 = vrcp.f32 %v2056_v33 }
 0x7fd   :  { %v2055_v14 = vpop.xlane.xlu0 %2054 }
 0x7fe   :  { %v2057_v19 = vmax.f32 %v2055_v14, 1e-09 }
 0x800   :  { %3026 = vrcp.f32 %v2057_v19 }
 0x801   :  { %v2405_v1 = vpop.xlane.xlu0 %2404 }
 0x802   :  { %v2409_v27 = vmax.f32 %v2405_v1, 1e-09 }
 0x804   :  { %3028 = vrcp.f32 %v2409_v27 }
 0x805   :  { %v2408_v5 = vpop.xlane.xlu0 %2407 }
 0x806   :  { %v2410_v45 = vmax.f32 %v2408_v5, 1e-09 }
 0x808   :  { %3030 = vrcp.f32 %v2410_v45 }
 0x809   :  { %v3025_v10 = vpop.eup %3024  ;;  %v2418_v22 = vpop.permute.xlu0 %2417 }
 0x80a   :  { %v2060_v43 = vmul.f32 %v3025_v10, %v2048_v63 }
 0x80d   :  { %v3027_v56 = vpop.eup %3026 }
 0x80e   :  { %v2061_v37 = vmul.f32 %v3027_v56, %v2049_v62 }
 0x810   :  { %v2062_v8 = vpack.c.bf16 %v2061_v37, %v2060_v43 }
 0x811   :  { %v3029_v42 = vpop.eup %3028 }
 0x812   :  { %2812 = vmatmul.mubr.msk.bf16.vlgmr.msra.gmra.mxu1 %vm4431_vm0, %v2062_v8  ;;  %v2413_v13 = vmul.f32 %v3029_v42, %v2401_v17 }
 0x813   :  { %2816 = vmatpush3.bf16.msra.mxu1 %v2418_v22  ;;  %2817 = vmatprep.mubr.msk.bf16.mxu1 %vm4432_vm11, %v4377_v28 }
 0x814   :  { %2821 = vmatprep.subr.bf16.mxu1 %v4377_v28 }
 0x815   :  { %v3031_v38 = vpop.eup %3030 }
 0x816   :  { %v2414_v48 = vmul.f32 %v3031_v38, %v2402_v15 }
 0x818   :  { %v2415_v41 = vpack.c.bf16 %v2414_v48, %v2413_v13 }
 0x81a   :  { %2818 = vmatmul.mubr.msk.bf16.vlgmr.msra.gmra.mxu1 %vm4433_vm12, %v2415_v41 }
 0x81b   :  { %2823 = vmatprep.mubr.msk.bf16.mxu1 %vm4432_vm11, %v4377_v28 }
 0x8d2   :  { %v2100_v36 = vpop.f32.mrf.mxu1 }
 0x8d3   :  { %2107 = vst.msk [vmem:[#allocation2] sm:$0xff] %vm896_vm2, %v2100_v36 }
 0x8d4   :  { %v2813_v9 = vpop.f32.mrf.mxu1 }
 0x8d6   :  { %v2103_v31 = vpop.f32.mrf.mxu1 }
 0x8d7   :  { %2108 = vst.msk [vmem:[#allocation2 + $0x8] sm:$0xff] %vm896_vm2, %v2103_v31  ;;  %vm4434_vm2 = vmmov %vm4431_vm0 }
 0x8d8   :  { %v2814_v55 = vpop.f32.mrf.mxu1 }
 0x8da   :  { %v2457_v60 = vpop.f32.mrf.mxu1 }
 0x8db   :  { %2466 = vrot.lane.b32.xlu0 %v2457_v60, %s3067_s11 }
 0x8dc   :  { %v2819_v30 = vpop.f32.mrf.mxu1 }
 0x8de   :  { %v2460_v54 = vpop.f32.mrf.mxu1 }
 0x8df   :  { %2468 = vrot.lane.b32.xlu1 %v2460_v54, %s3067_s11 }
 0x8e0   :  { %v2820_v32 = vpop.f32.mrf.mxu1 }
 0x94d   :  { %v2467_v34 = vpop.permute.xlu0 %2466 }
 0x94e   :  { %2472 = vst.msk [vmem:[#allocation2] sm:$0xff] %vm654_vm7, %v2467_v34 }
 0x951   :  { %v2469_v4 = vpop.permute.xlu1 %2468 }
 0x952   :  { %2473 = vst.msk [vmem:[#allocation2 + $0x8] sm:$0xff] %vm654_vm7, %v2469_v4  ;;  %vm4435_vm7 = vmmov %vm4431_vm0 }
 0x955   :  { %v2474_v26 = vld [vmem:[#allocation2] sm:$0xff] }
 0x959   :  { %v2475_v44 = vld [vmem:[#allocation2 + $0x8] sm:$0xff] }
 0x95a   :  { %v2476_v16 = vpack.c.bf16 %v2475_v44, %v2474_v26 }
 0x95c   :  { %2822 = vmatpush3.bf16.msra.mxu1 %v2476_v16 }
 0x95d   :  { %2827 = vmatprep.subr.bf16.mxu1 %v4377_v28 }
 0x95f   :  { %2824 = vmatmul.mubr.msk.bf16.vlgmr.msra.gmra.mxu1 %vm4434_vm2, %v2477_v24 }
 0x960   :  { %2829 = vmatprep.mubr.msk.bf16.mxu1 %vm4432_vm11, %v4377_v28  ;;  %2828 = vmatpush3.bf16.msra.mxu1 %v2999_v59 }
 0xa1f   :  { %v2515_v29 = vpop.f32.mrf.mxu1 }
 0xa20   :  { %v2521_v25 = vpack.c.bf16 %v2515_v29, %v2515_v29 }
 0xa21   :  { %v2825_v52 = vpop.f32.mrf.mxu1 }
 0xa22   :  { %2830 = vmatmul.mubr.msk.bf16.vlgmr.msra.gmra.mxu1 %vm4435_vm7, %v2521_v25 }
 0xa23   :  { %v2518_v2 = vpop.f32.mrf.mxu1 }
 0xa25   :  { %v2826_v40 = vpop.f32.mrf.mxu1 }
 0xae2   :  { %v2574_v0 = vpop.f32.mrf.mxu1 }
 0xae3   :  { %v2575_v18 = vadd.f32 %v2664_v51, %v2574_v0 }
 0xae4   :  { %v2831_v28 = vpop.f32.mrf.mxu1 }
 0xae5   :  { %v2581_v57 = vsel %vm2580_vm13, %v2575_v18, -inf }
 0xae6   :  { %2582 = vmax.xlane.f32.xlu0 %v2581_v57  ;;  %v2577_v49 = vpop.f32.mrf.mxu1 }
 0xae8   :  { %v2832_v50 = vpop.f32.mrf.mxu1 }
 0xb6f   :  { %v2583_v3 = vpop.xlane.xlu0 %2582 }
 0xb70   :  { %v2584_v58 = vsub.f32 %v2575_v18, %v2583_v3 }
 0xb72   :  { %v2585_v23 = vmul.f32 1.442695, %v2584_v58 }
 0xb74   :  { %3032 = vpow2.f32 %v2585_v23 }
 0xb81   :  { %v3033_v11 = vpop.eup %3032 }
 0xb82   :  { %v2587_v47 = vsel %vm2580_vm13, %v3033_v11, 0.0 }
 0xb83   :  { %2588 = vadd.xlane.f32.xlu1 %v2587_v47 }
 0xc0c   :  { %v2589_v46 = vpop.xlane.xlu1 %2588 }
 0xc0d   :  { %3034 = vrcp.f32 %v2589_v46 }
 0xc1a   :  { %v3035_v12 = vpop.eup %3034 }
 0xc1b   :  { %v2591_v63 = vmul.f32 %v3035_v12, %v3033_v11 }
 0xc1d   :  { %2592 = vst.msk [vmem:[#allocation3] sm:$0x3] %vm2580_vm13, %v2591_v63 }
 0xc1e   :  { %3047 = shalt.err (!%p3044_p4)
}
 0xc1f   :  { %2602 = dma.vmem_to_hbm [thread:$0]  %s2600_s9, 32, %s4269_s10, [#allocation4]  }
 0xc20   :  { %3056 = dma.done.wait [#allocation4], 32  }
 0xc21   :  { %3057 = vsyncadd [#allocation4], 4294967264 }
 0xc22   :  { %2606 = vsyncpa [#allocation4], 1 }

</bundles_post_ra>
